<compile_context>
chip_gen: v7x
topology: tpu7x:2x2x1
jax: 0.10.0
libtpu: 0.0.40
codegen_flags: <defaults>
</compile_context>

<pallas_src>
import functools

import jax
import jax.numpy as jnp
from jax.experimental import pallas as pl
from jax.experimental.pallas import tpu as pltpu


def _round_up(x, m):
    return (x + m - 1) // m * m


# ------------------------------ Pallas kernel ------------------------------ #

def _basic_block_kernel(x_ref, masks_ref, w1_ref, b1_ref, w2_ref, b2_ref,
                        out_ref, patches_ref, out1_ref, *, H, W, b_tile):
    """Fused BasicBlock body for one tile of B_TILE images.

    Layout: channels on sublanes, (batch-tile x flattened spatial) on lanes.
      x_ref       : (Cp, L)      L = b_tile*H*W, input images (channel-major)
      masks_ref   : (9, L)       per-tap border-validity masks (0/1, f32)
      w1_ref      : (Pp, 9*Cp)   conv1 weights with BN1 scale folded in
      b1_ref      : (Pp, 1)      folded BN1 bias
      w2_ref      : (Pp, 9*Pp)   conv2 weights with BN2 scale folded in
      b2_ref      : (Pp, 1)      folded BN2 bias
      out_ref     : (Pp, L)
      patches_ref : (9*Cp, L)    im2col VMEM scratch, shared by both convs
      out1_ref    : (Pp, L)      VMEM staging for conv1's activated output
    """
    HW = H * W
    L = b_tile * HW
    Cp = x_ref.shape[0]

    # np.roll-style shifts for the 9 taps over the concatenated lane axis.
    # Wrap-around across image boundaries is zeroed by the border masks.
    shifts = [(-(dy * W + dx)) % L for dy in (-1, 0, 1) for dx in (-1, 0, 1)]

    def im2col(src_ref, cin):
        # Each tap: XLU lane roll + VPU mask multiply, written as an
        # 8-sublane-aligned block into the shared im2col scratch.
        for t in range(9):
            a = src_ref[...]                                   # (cin, L)
            if shifts[t]:
                a = pltpu.roll(a, shifts[t], 1)
            if t != 4:                                         # centre: all-ones mask
                a = a * masks_ref[t:t + 1, :]
            patches_ref[t * cin:(t + 1) * cin, :] = a

    # conv1 + bn1 + relu -- ONE MXU matmul (K = 9*Cp, N = L lanes); the
    # intermediate is staged in VMEM, never round-trips HBM and never has to
    # live in vregs across the next 9-tap loop.
    im2col(x_ref, Cp)
    out1_ref[...] = jnp.maximum(
        jnp.dot(w1_ref[...], patches_ref[...],
                preferred_element_type=jnp.float32) + b1_ref[...], 0.0)

    # conv2 + bn2 + residual add (re-read from x_ref) + relu.
    im2col(out1_ref, out1_ref.shape[0])
    out2 = (jnp.dot(w2_ref[...], patches_ref[...],
                    preferred_element_type=jnp.float32)
            + b2_ref[...] + x_ref[...])
    out_ref[...] = jnp.maximum(out2, 0.0).astype(out_ref.dtype)


# ------------------------------ JAX wrapper -------------------------------- #

def _fold_bn(gamma, beta, mean, var, eps):
    scale = gamma / jnp.sqrt(var + eps)
    return scale, beta - mean * scale


def _prep_conv_bn(w_oihw, gamma, beta, mean, var, cin_p, cout_p, eps):
    """Fold eval-mode BN into the conv and lay out as an im2col weight matrix."""
    o, i = w_oihw.shape[0], w_oihw.shape[1]
    scale, bias = _fold_bn(gamma, beta, mean, var, eps)
    w = w_oihw * scale[:, None, None, None]                      # BN scale fold
    w = jnp.pad(w, ((0, cout_p - o), (0, cin_p - i), (0, 0), (0, 0)))
    # (Op, Ip, 3, 3) -> (Op, 3, 3, Ip) -> (Op, 9*Ip); col = (dy*3+dx)*Ip + ci
    w_mat = jnp.transpose(w, (0, 2, 3, 1)).reshape(cout_p, 9 * cin_p)
    b = jnp.pad(bias, (0, cout_p - o)).reshape(cout_p, 1)
    return w_mat.astype(jnp.float32), b.astype(jnp.float32)


def _make_masks(H, W, b_tile):
    """9 border-validity masks, tiled over the batch tile: (9, b_tile*H*W)."""
    HW = H * W
    pos = jnp.arange(HW, dtype=jnp.int32)
    row, col = pos // W, pos % W
    ms = []
    for dy in (-1, 0, 1):
        for dx in (-1, 0, 1):
            ms.append((row + dy >= 0) & (row + dy < H)
                      & (col + dx >= 0) & (col + dx < W))
    masks = jnp.stack(ms).astype(jnp.float32)                    # (9, HW)
    return jnp.tile(masks, (1, b_tile))                          # (9, b_tile*HW)


def _pick_b_tile(n, hw, cp, pp):
    """Amortize per-step overhead, keep >=2 grid steps (v7x dual-TC), keep the
    lane block a multiple of 128, and stay within a conservative VMEM budget."""
    bt = max(1, min(8, n // 2)) if n > 1 else 1

    def vmem_bytes(b):       # 2x-buffered x/out blocks + im2col + staging (f32)
        return 4 * b * hw * (2 * cp + 2 * pp + 9 * cp + pp)

    while bt > 1 and vmem_bytes(bt) > 24 * 1024 * 1024:          # v7x headroom
        bt -= 1
    while (bt * hw) % 128 != 0:                                  # lane-dense I/O
        bt += 1
    return bt


@jax.jit
def basic_block_forward(x_nchw, params, eps=1e-5):
    """BasicBlock forward (stride=1, downsample=None), eval-mode BN. x: NCHW."""
    N, C, H, W = x_nchw.shape
    HW = H * W
    P = params["conv1_w"].shape[0]
    assert P == C, "stride=1 / no-downsample BasicBlock needs planes == inplanes"
    Cp = _round_up(C, 8)      # channels sit on the 8-sublane axis
    Pp = _round_up(P, 8)

    B_TILE = _pick_b_tile(N, HW, Cp, Pp)
    Np = _round_up(N, B_TILE)
    L = B_TILE * HW

    w1, b1 = _prep_conv_bn(params["conv1_w"], params["bn1_gamma"],
                           params["bn1_beta"], params["bn1_mean"],
                           params["bn1_var"], Cp, Pp, eps)
    w2, b2 = _prep_conv_bn(params["conv2_w"], params["bn2_gamma"],
                           params["bn2_beta"], params["bn2_mean"],
                           params["bn2_var"], Pp, Pp, eps)
    masks = _make_masks(H, W, B_TILE)

    # NCHW -> channel-major (Cp, Np*HW): channels on sublanes, batch-tile x
    # spatial on the lane axis (lane-dense I/O). Wrapper-side layout plumbing;
    # padded channels / padded images are zero.
    x_cm = jnp.transpose(x_nchw, (1, 0, 2, 3)).reshape(C, N, HW)
    x_cm = jnp.pad(x_cm, ((0, Cp - C), (0, Np - N), (0, 0)))
    x_flat = x_cm.reshape(Cp, Np * HW).astype(jnp.float32)

    flops = int(Np) * 2 * (2 * 9 * Cp * Pp * HW)     # two convs, 2 flops / MAC
    bytes_accessed = 4 * (2 * Cp * Np * HW + 2 * Pp * 9 * Cp + int(masks.size))

    kernel = functools.partial(_basic_block_kernel, H=H, W=W, b_tile=B_TILE)
    out = pl.pallas_call(
        kernel,
        out_shape=jax.ShapeDtypeStruct((Pp, Np * HW), x_nchw.dtype),
        grid=(Np // B_TILE,),
        in_specs=[
            pl.BlockSpec((Cp, L), lambda n: (0, n)),        # x batch-tile
            pl.BlockSpec((9, L), lambda n: (0, 0)),         # border masks (resident)
            pl.BlockSpec((Pp, 9 * Cp), lambda n: (0, 0)),   # w1 (resident)
            pl.BlockSpec((Pp, 1), lambda n: (0, 0)),        # b1
            pl.BlockSpec((Pp, 9 * Pp), lambda n: (0, 0)),   # w2
            pl.BlockSpec((Pp, 1), lambda n: (0, 0)),        # b2
        ],
        out_specs=pl.BlockSpec((Pp, L), lambda n: (0, n)),
        scratch_shapes=[
            pltpu.VMEM((9 * Cp, L), jnp.float32),           # shared im2col scratch
            pltpu.VMEM((Pp, L), jnp.float32),               # conv1 output staging
        ],
        compiler_params=pltpu.CompilerParams(
            dimension_semantics=("parallel",)),  # batch tiles across both TCs (v7x)
        cost_estimate=pl.CostEstimate(flops=flops, transcendentals=0,
                                      bytes_accessed=bytes_accessed),
    )(x_flat, masks, w1, b1, w2, b2)

    out = out.reshape(Pp, Np, HW)[:P, :N]                   # drop channel/batch pad
    return jnp.transpose(out, (1, 0, 2)).reshape(N, P, H, W)


# ------------------------------- Reference --------------------------------- #

def _ref_forward(x_nchw, params, eps=1e-5):
    def conv(x, w):
        return jax.lax.conv_general_dilated(
            x, w, window_strides=(1, 1), padding=((1, 1), (1, 1)),
            dimension_numbers=("NCHW", "OIHW", "NCHW"))

    def bn(x, g, b, m, v):
        g = g.reshape(1, -1, 1, 1); b = b.reshape(1, -1, 1, 1)
        m = m.reshape(1, -1, 1, 1); v = v.reshape(1, -1, 1, 1)
        return (x - m) / jnp.sqrt(v + eps) * g + b

    out = conv(x_nchw, params["conv1_w"])
    out = bn(out, params["bn1_gamma"], params["bn1_beta"],
             params["bn1_mean"], params["bn1_var"])
    out = jnp.maximum(out, 0.0)
    out = conv(out, params["conv2_w"])
    out = bn(out, params["bn2_gamma"], params["bn2_beta"],
             params["bn2_mean"], params["bn2_var"])
    out = out + x_nchw
    return jnp.maximum(out, 0.0)


# --------------------------------- Main ------------------------------------ #

if __name__ == "__main__":
    key = jax.random.PRNGKey(0)
    N, C, H, W = 8, 4, 16, 16          # inplanes = planes = 4, stride = 1
    planes = C

    keys = jax.random.split(key, 9)
    params = {
        "conv1_w": 0.1 * jax.random.normal(keys[0], (planes, C, 3, 3), jnp.float32),
        "conv2_w": 0.1 * jax.random.normal(keys[1], (planes, planes, 3, 3), jnp.float32),
        "bn1_gamma": 1.0 + 0.1 * jax.random.normal(keys[2], (planes,), jnp.float32),
        "bn1_beta": 0.1 * jax.random.normal(keys[3], (planes,), jnp.float32),
        "bn1_mean": 0.05 * jax.random.normal(keys[4], (planes,), jnp.float32),
        "bn1_var": jnp.abs(1.0 + 0.1 * jax.random.normal(keys[5], (planes,), jnp.float32)),
        "bn2_gamma": 1.0 + 0.1 * jax.random.normal(keys[6], (planes,), jnp.float32),
        "bn2_beta": 0.1 * jax.random.normal(keys[7], (planes,), jnp.float32),
        "bn2_mean": jnp.zeros((planes,), jnp.float32),
        "bn2_var": jnp.ones((planes,), jnp.float32),
    }

    x = jax.random.normal(keys[8], (N, C, H, W), jnp.float32)

    out = jax.block_until_ready(basic_block_forward(x, params))
    ref = jax.block_until_ready(_ref_forward(x, params))

    assert out.shape == (N, planes, H, W)
    assert jnp.allclose(out, ref, atol=1e-4, rtol=1e-4), "mismatch vs reference"
    print("KERNEL_OK")
</pallas_src>

<mosaic_0001>
module attributes {stable_mosaic.version = 11 : i64} {
  func.func @_basic_block_kernel(%arg0: i32, %arg1: memref<8x1024xf32, #tpu.memory_space<vmem>>, %arg2: memref<9x1024xf32, #tpu.memory_space<vmem>>, %arg3: memref<8x72xf32, #tpu.memory_space<vmem>>, %arg4: memref<8x1xf32, #tpu.memory_space<vmem>>, %arg5: memref<8x72xf32, #tpu.memory_space<vmem>>, %arg6: memref<8x1xf32, #tpu.memory_space<vmem>>, %arg7: memref<8x1024xf32, #tpu.memory_space<vmem>>, %arg8: memref<72x1024xf32, #tpu.memory_space<vmem>>, %arg9: memref<8x1024xf32, #tpu.memory_space<vmem>>) attributes {dimension_semantics = [#tpu.dimension_semantics<parallel>], iteration_bounds = array<i64: 2>, scalar_prefetch = 0 : i64, scratch_operands = 2 : i64, tpu.core_type = #tpu.core_type<tc>, window_params = [{transform_indices = @transform_0, window_bounds = array<i64: 8, 1024>}, {pipeline_mode = #tpu.pipeline_mode<synchronous>, transform_indices = @transform_1, window_bounds = array<i64: 9, 1024>}, {pipeline_mode = #tpu.pipeline_mode<synchronous>, transform_indices = @transform_2, window_bounds = array<i64: 8, 72>}, {pipeline_mode = #tpu.pipeline_mode<synchronous>, transform_indices = @transform_3, window_bounds = array<i64: 8, 1>}, {pipeline_mode = #tpu.pipeline_mode<synchronous>, transform_indices = @transform_4, window_bounds = array<i64: 8, 72>}, {pipeline_mode = #tpu.pipeline_mode<synchronous>, transform_indices = @transform_5, window_bounds = array<i64: 8, 1>}, {transform_indices = @transform_6, window_bounds = array<i64: 8, 1024>}]} {
    %c0 = arith.constant 0 : index
    %c0_0 = arith.constant 0 : index
    %0 = vector.load %arg1[%c0, %c0_0] : memref<8x1024xf32, #tpu.memory_space<vmem>>, vector<8x1024xf32>
    %c17_i32 = arith.constant 17 : i32
    %1 = tpu.dynamic_rotate %0 by %c17_i32 dim 1 : vector<8x1024xf32>, i32 -> vector<8x1024xf32>
    %c0_1 = arith.constant 0 : index
    %c0_2 = arith.constant 0 : index
    %2 = vector.load %arg2[%c0_1, %c0_2] : memref<9x1024xf32, #tpu.memory_space<vmem>>, vector<1x1024xf32>
    %3 = vector.broadcast %2 : vector<1x1024xf32> to vector<8x1024xf32>
    %4 = arith.mulf %1, %3 : vector<8x1024xf32>
    %c0_3 = arith.constant 0 : index
    %c0_4 = arith.constant 0 : index
    %5 = vector.load %arg8[%c0_3, %c0_4] : memref<72x1024xf32, #tpu.memory_space<vmem>>, vector<8x1024xf32>
    tpu.vector_store %arg8[%c0_3, %c0_4], %4 {strides = array<i32>} : memref<72x1024xf32, #tpu.memory_space<vmem>>, vector<8x1024xf32>,
    %c0_5 = arith.constant 0 : index
    %c0_6 = arith.constant 0 : index
    %6 = vector.load %arg1[%c0_5, %c0_6] : memref<8x1024xf32, #tpu.memory_space<vmem>>, vector<8x1024xf32>
    %c16_i32 = arith.constant 16 : i32
    %7 = tpu.dynamic_rotate %6 by %c16_i32 dim 1 : vector<8x1024xf32>, i32 -> vector<8x1024xf32>
    %c1 = arith.constant 1 : index
    %c0_7 = arith.constant 0 : index
    %8 = vector.load %arg2[%c1, %c0_7] : memref<9x1024xf32, #tpu.memory_space<vmem>>, vector<1x1024xf32>
    %9 = vector.broadcast %8 : vector<1x1024xf32> to vector<8x1024xf32>
    %10 = arith.mulf %7, %9 : vector<8x1024xf32>
    %c8 = arith.constant 8 : index
    %c0_8 = arith.constant 0 : index
    %11 = vector.load %arg8[%c8, %c0_8] : memref<72x1024xf32, #tpu.memory_space<vmem>>, vector<8x1024xf32>
    tpu.vector_store %arg8[%c8, %c0_8], %10 {strides = array<i32>} : memref<72x1024xf32, #tpu.memory_space<vmem>>, vector<8x1024xf32>,
    %c0_9 = arith.constant 0 : index
    %c0_10 = arith.constant 0 : index
    %12 = vector.load %arg1[%c0_9, %c0_10] : memref<8x1024xf32, #tpu.memory_space<vmem>>, vector<8x1024xf32>
    %c15_i32 = arith.constant 15 : i32
    %13 = tpu.dynamic_rotate %12 by %c15_i32 dim 1 : vector<8x1024xf32>, i32 -> vector<8x1024xf32>
    %c2 = arith.constant 2 : index
    %c0_11 = arith.constant 0 : index
    %14 = vector.load %arg2[%c2, %c0_11] : memref<9x1024xf32, #tpu.memory_space<vmem>>, vector<1x1024xf32>
    %15 = vector.broadcast %14 : vector<1x1024xf32> to vector<8x1024xf32>
    %16 = arith.mulf %13, %15 : vector<8x1024xf32>
    %c16 = arith.constant 16 : index
    %c0_12 = arith.constant 0 : index
    %17 = vector.load %arg8[%c16, %c0_12] : memref<72x1024xf32, #tpu.memory_space<vmem>>, vector<8x1024xf32>
    tpu.vector_store %arg8[%c16, %c0_12], %16 {strides = array<i32>} : memref<72x1024xf32, #tpu.memory_space<vmem>>, vector<8x1024xf32>,
    %c0_13 = arith.constant 0 : index
    %c0_14 = arith.constant 0 : index
    %18 = vector.load %arg1[%c0_13, %c0_14] : memref<8x1024xf32, #tpu.memory_space<vmem>>, vector<8x1024xf32>
    %c1_i32 = arith.constant 1 : i32
    %19 = tpu.dynamic_rotate %18 by %c1_i32 dim 1 : vector<8x1024xf32>, i32 -> vector<8x1024xf32>
    %c3 = arith.constant 3 : index
    %c0_15 = arith.constant 0 : index
    %20 = vector.load %arg2[%c3, %c0_15] : memref<9x1024xf32, #tpu.memory_space<vmem>>, vector<1x1024xf32>
    %21 = vector.broadcast %20 : vector<1x1024xf32> to vector<8x1024xf32>
    %22 = arith.mulf %19, %21 : vector<8x1024xf32>
    %c24 = arith.constant 24 : index
    %c0_16 = arith.constant 0 : index
    %23 = vector.load %arg8[%c24, %c0_16] : memref<72x1024xf32, #tpu.memory_space<vmem>>, vector<8x1024xf32>
    tpu.vector_store %arg8[%c24, %c0_16], %22 {strides = array<i32>} : memref<72x1024xf32, #tpu.memory_space<vmem>>, vector<8x1024xf32>,
    %c0_17 = arith.constant 0 : index
    %c0_18 = arith.constant 0 : index
    %24 = vector.load %arg1[%c0_17, %c0_18] : memref<8x1024xf32, #tpu.memory_space<vmem>>, vector<8x1024xf32>
    %c32 = arith.constant 32 : index
    %c0_19 = arith.constant 0 : index
    %25 = vector.load %arg8[%c32, %c0_19] : memref<72x1024xf32, #tpu.memory_space<vmem>>, vector<8x1024xf32>
    tpu.vector_store %arg8[%c32, %c0_19], %24 {strides = array<i32>} : memref<72x1024xf32, #tpu.memory_space<vmem>>, vector<8x1024xf32>,
    %c0_20 = arith.constant 0 : index
    %c0_21 = arith.constant 0 : index
    %26 = vector.load %arg1[%c0_20, %c0_21] : memref<8x1024xf32, #tpu.memory_space<vmem>>, vector<8x1024xf32>
    %c1023_i32 = arith.constant 1023 : i32
    %27 = tpu.dynamic_rotate %26 by %c1023_i32 dim 1 : vector<8x1024xf32>, i32 -> vector<8x1024xf32>
    %c5 = arith.constant 5 : index
    %c0_22 = arith.constant 0 : index
    %28 = vector.load %arg2[%c5, %c0_22] : memref<9x1024xf32, #tpu.memory_space<vmem>>, vector<1x1024xf32>
    %29 = vector.broadcast %28 : vector<1x1024xf32> to vector<8x1024xf32>
    %30 = arith.mulf %27, %29 : vector<8x1024xf32>
    %c40 = arith.constant 40 : index
    %c0_23 = arith.constant 0 : index
    %31 = vector.load %arg8[%c40, %c0_23] : memref<72x1024xf32, #tpu.memory_space<vmem>>, vector<8x1024xf32>
    tpu.vector_store %arg8[%c40, %c0_23], %30 {strides = array<i32>} : memref<72x1024xf32, #tpu.memory_space<vmem>>, vector<8x1024xf32>,
    %c0_24 = arith.constant 0 : index
    %c0_25 = arith.constant 0 : index
    %32 = vector.load %arg1[%c0_24, %c0_25] : memref<8x1024xf32, #tpu.memory_space<vmem>>, vector<8x1024xf32>
    %c1009_i32 = arith.constant 1009 : i32
    %33 = tpu.dynamic_rotate %32 by %c1009_i32 dim 1 : vector<8x1024xf32>, i32 -> vector<8x1024xf32>
    %c6 = arith.constant 6 : index
    %c0_26 = arith.constant 0 : index
    %34 = vector.load %arg2[%c6, %c0_26] : memref<9x1024xf32, #tpu.memory_space<vmem>>, vector<1x1024xf32>
    %35 = vector.broadcast %34 : vector<1x1024xf32> to vector<8x1024xf32>
    %36 = arith.mulf %33, %35 : vector<8x1024xf32>
    %c48 = arith.constant 48 : index
    %c0_27 = arith.constant 0 : index
    %37 = vector.load %arg8[%c48, %c0_27] : memref<72x1024xf32, #tpu.memory_space<vmem>>, vector<8x1024xf32>
    tpu.vector_store %arg8[%c48, %c0_27], %36 {strides = array<i32>} : memref<72x1024xf32, #tpu.memory_space<vmem>>, vector<8x1024xf32>,
    %c0_28 = arith.constant 0 : index
    %c0_29 = arith.constant 0 : index
    %38 = vector.load %arg1[%c0_28, %c0_29] : memref<8x1024xf32, #tpu.memory_space<vmem>>, vector<8x1024xf32>
    %c1008_i32 = arith.constant 1008 : i32
    %39 = tpu.dynamic_rotate %38 by %c1008_i32 dim 1 : vector<8x1024xf32>, i32 -> vector<8x1024xf32>
    %c7 = arith.constant 7 : index
    %c0_30 = arith.constant 0 : index
    %40 = vector.load %arg2[%c7, %c0_30] : memref<9x1024xf32, #tpu.memory_space<vmem>>, vector<1x1024xf32>
    %41 = vector.broadcast %40 : vector<1x1024xf32> to vector<8x1024xf32>
    %42 = arith.mulf %39, %41 : vector<8x1024xf32>
    %c56 = arith.constant 56 : index
    %c0_31 = arith.constant 0 : index
    %43 = vector.load %arg8[%c56, %c0_31] : memref<72x1024xf32, #tpu.memory_space<vmem>>, vector<8x1024xf32>
    tpu.vector_store %arg8[%c56, %c0_31], %42 {strides = array<i32>} : memref<72x1024xf32, #tpu.memory_space<vmem>>, vector<8x1024xf32>,
    %c0_32 = arith.constant 0 : index
    %c0_33 = arith.constant 0 : index
    %44 = vector.load %arg1[%c0_32, %c0_33] : memref<8x1024xf32, #tpu.memory_space<vmem>>, vector<8x1024xf32>
    %c1007_i32 = arith.constant 1007 : i32
    %45 = tpu.dynamic_rotate %44 by %c1007_i32 dim 1 : vector<8x1024xf32>, i32 -> vector<8x1024xf32>
    %c8_34 = arith.constant 8 : index
    %c0_35 = arith.constant 0 : index
    %46 = vector.load %arg2[%c8_34, %c0_35] : memref<9x1024xf32, #tpu.memory_space<vmem>>, vector<1x1024xf32>
    %47 = vector.broadcast %46 : vector<1x1024xf32> to vector<8x1024xf32>
    %48 = arith.mulf %45, %47 : vector<8x1024xf32>
    %c64 = arith.constant 64 : index
    %c0_36 = arith.constant 0 : index
    %49 = vector.load %arg8[%c64, %c0_36] : memref<72x1024xf32, #tpu.memory_space<vmem>>, vector<8x1024xf32>
    tpu.vector_store %arg8[%c64, %c0_36], %48 {strides = array<i32>} : memref<72x1024xf32, #tpu.memory_space<vmem>>, vector<8x1024xf32>,
    %c0_37 = arith.constant 0 : index
    %c0_38 = arith.constant 0 : index
    %50 = vector.load %arg3[%c0_37, %c0_38] : memref<8x72xf32, #tpu.memory_space<vmem>>, vector<8x72xf32>
    %c0_39 = arith.constant 0 : index
    %c0_40 = arith.constant 0 : index
    %51 = vector.load %arg8[%c0_39, %c0_40] : memref<72x1024xf32, #tpu.memory_space<vmem>>, vector<72x1024xf32>
    %cst = arith.constant dense<0.000000e+00> : vector<8x1024xf32>
    %52 = tpu.matmul %50, %51, %cst {dimension_numbers = #tpu.dot_dimension_numbers<[1], [0], [0], [1], [0, 0, 1, 1], [], []>} : vector<8x72xf32>, vector<72x1024xf32>, vector<8x1024xf32> -> vector<8x1024xf32>
    %c0_41 = arith.constant 0 : index
    %c0_42 = arith.constant 0 : index
    %53 = vector.load %arg4[%c0_41, %c0_42] : memref<8x1xf32, #tpu.memory_space<vmem>>, vector<8x1xf32>
    %54 = vector.broadcast %53 : vector<8x1xf32> to vector<8x1024xf32>
    %55 = arith.addf %52, %54 : vector<8x1024xf32>
    %cst_43 = arith.constant 0.000000e+00 : f32
    %56 = vector.broadcast %cst_43 : f32 to vector<8x1024xf32>
    %57 = arith.maximumf %55, %56 : vector<8x1024xf32>
    %c0_44 = arith.constant 0 : index
    %c0_45 = arith.constant 0 : index
    %58 = vector.load %arg9[%c0_44, %c0_45] : memref<8x1024xf32, #tpu.memory_space<vmem>>, vector<8x1024xf32>
    tpu.vector_store %arg9[%c0_44, %c0_45], %57 {strides = array<i32>} : memref<8x1024xf32, #tpu.memory_space<vmem>>, vector<8x1024xf32>,
    %c0_46 = arith.constant 0 : index
    %c0_47 = arith.constant 0 : index
    %59 = vector.load %arg9[%c0_46, %c0_47] : memref<8x1024xf32, #tpu.memory_space<vmem>>, vector<8x1024xf32>
    %c17_i32_48 = arith.constant 17 : i32
    %60 = tpu.dynamic_rotate %59 by %c17_i32_48 dim 1 : vector<8x1024xf32>, i32 -> vector<8x1024xf32>
    %c0_49 = arith.constant 0 : index
    %c0_50 = arith.constant 0 : index
    %61 = vector.load %arg2[%c0_49, %c0_50] : memref<9x1024xf32, #tpu.memory_space<vmem>>, vector<1x1024xf32>
    %62 = vector.broadcast %61 : vector<1x1024xf32> to vector<8x1024xf32>
    %63 = arith.mulf %60, %62 : vector<8x1024xf32>
    %c0_51 = arith.constant 0 : index
    %c0_52 = arith.constant 0 : index
    %64 = vector.load %arg8[%c0_51, %c0_52] : memref<72x1024xf32, #tpu.memory_space<vmem>>, vector<8x1024xf32>
    tpu.vector_store %arg8[%c0_51, %c0_52], %63 {strides = array<i32>} : memref<72x1024xf32, #tpu.memory_space<vmem>>, vector<8x1024xf32>,
    %c0_53 = arith.constant 0 : index
    %c0_54 = arith.constant 0 : index
    %65 = vector.load %arg9[%c0_53, %c0_54] : memref<8x1024xf32, #tpu.memory_space<vmem>>, vector<8x1024xf32>
    %c16_i32_55 = arith.constant 16 : i32
    %66 = tpu.dynamic_rotate %65 by %c16_i32_55 dim 1 : vector<8x1024xf32>, i32 -> vector<8x1024xf32>
    %c1_56 = arith.constant 1 : index
    %c0_57 = arith.constant 0 : index
    %67 = vector.load %arg2[%c1_56, %c0_57] : memref<9x1024xf32, #tpu.memory_space<vmem>>, vector<1x1024xf32>
    %68 = vector.broadcast %67 : vector<1x1024xf32> to vector<8x1024xf32>
    %69 = arith.mulf %66, %68 : vector<8x1024xf32>
    %c8_58 = arith.constant 8 : index
    %c0_59 = arith.constant 0 : index
    %70 = vector.load %arg8[%c8_58, %c0_59] : memref<72x1024xf32, #tpu.memory_space<vmem>>, vector<8x1024xf32>
    tpu.vector_store %arg8[%c8_58, %c0_59], %69 {strides = array<i32>} : memref<72x1024xf32, #tpu.memory_space<vmem>>, vector<8x1024xf32>,
    %c0_60 = arith.constant 0 : index
    %c0_61 = arith.constant 0 : index
    %71 = vector.load %arg9[%c0_60, %c0_61] : memref<8x1024xf32, #tpu.memory_space<vmem>>, vector<8x1024xf32>
    %c15_i32_62 = arith.constant 15 : i32
    %72 = tpu.dynamic_rotate %71 by %c15_i32_62 dim 1 : vector<8x1024xf32>, i32 -> vector<8x1024xf32>
    %c2_63 = arith.constant 2 : index
    %c0_64 = arith.constant 0 : index
    %73 = vector.load %arg2[%c2_63, %c0_64] : memref<9x1024xf32, #tpu.memory_space<vmem>>, vector<1x1024xf32>
    %74 = vector.broadcast %73 : vector<1x1024xf32> to vector<8x1024xf32>
    %75 = arith.mulf %72, %74 : vector<8x1024xf32>
    %c16_65 = arith.constant 16 : index
    %c0_66 = arith.constant 0 : index
    %76 = vector.load %arg8[%c16_65, %c0_66] : memref<72x1024xf32, #tpu.memory_space<vmem>>, vector<8x1024xf32>
    tpu.vector_store %arg8[%c16_65, %c0_66], %75 {strides = array<i32>} : memref<72x1024xf32, #tpu.memory_space<vmem>>, vector<8x1024xf32>,
    %c0_67 = arith.constant 0 : index
    %c0_68 = arith.constant 0 : index
    %77 = vector.load %arg9[%c0_67, %c0_68] : memref<8x1024xf32, #tpu.memory_space<vmem>>, vector<8x1024xf32>
    %c1_i32_69 = arith.constant 1 : i32
    %78 = tpu.dynamic_rotate %77 by %c1_i32_69 dim 1 : vector<8x1024xf32>, i32 -> vector<8x1024xf32>
    %c3_70 = arith.constant 3 : index
    %c0_71 = arith.constant 0 : index
    %79 = vector.load %arg2[%c3_70, %c0_71] : memref<9x1024xf32, #tpu.memory_space<vmem>>, vector<1x1024xf32>
    %80 = vector.broadcast %79 : vector<1x1024xf32> to vector<8x1024xf32>
    %81 = arith.mulf %78, %80 : vector<8x1024xf32>
    %c24_72 = arith.constant 24 : index
    %c0_73 = arith.constant 0 : index
    %82 = vector.load %arg8[%c24_72, %c0_73] : memref<72x1024xf32, #tpu.memory_space<vmem>>, vector<8x1024xf32>
    tpu.vector_store %arg8[%c24_72, %c0_73], %81 {strides = array<i32>} : memref<72x1024xf32, #tpu.memory_space<vmem>>, vector<8x1024xf32>,
    %c0_74 = arith.constant 0 : index
    %c0_75 = arith.constant 0 : index
    %83 = vector.load %arg9[%c0_74, %c0_75] : memref<8x1024xf32, #tpu.memory_space<vmem>>, vector<8x1024xf32>
    %c32_76 = arith.constant 32 : index
    %c0_77 = arith.constant 0 : index
    %84 = vector.load %arg8[%c32_76, %c0_77] : memref<72x1024xf32, #tpu.memory_space<vmem>>, vector<8x1024xf32>
    tpu.vector_store %arg8[%c32_76, %c0_77], %83 {strides = array<i32>} : memref<72x1024xf32, #tpu.memory_space<vmem>>, vector<8x1024xf32>,
    %c0_78 = arith.constant 0 : index
    %c0_79 = arith.constant 0 : index
    %85 = vector.load %arg9[%c0_78, %c0_79] : memref<8x1024xf32, #tpu.memory_space<vmem>>, vector<8x1024xf32>
    %c1023_i32_80 = arith.constant 1023 : i32
    %86 = tpu.dynamic_rotate %85 by %c1023_i32_80 dim 1 : vector<8x1024xf32>, i32 -> vector<8x1024xf32>
    %c5_81 = arith.constant 5 : index
    %c0_82 = arith.constant 0 : index
    %87 = vector.load %arg2[%c5_81, %c0_82] : memref<9x1024xf32, #tpu.memory_space<vmem>>, vector<1x1024xf32>
    %88 = vector.broadcast %87 : vector<1x1024xf32> to vector<8x1024xf32>
    %89 = arith.mulf %86, %88 : vector<8x1024xf32>
    %c40_83 = arith.constant 40 : index
    %c0_84 = arith.constant 0 : index
    %90 = vector.load %arg8[%c40_83, %c0_84] : memref<72x1024xf32, #tpu.memory_space<vmem>>, vector<8x1024xf32>
    tpu.vector_store %arg8[%c40_83, %c0_84], %89 {strides = array<i32>} : memref<72x1024xf32, #tpu.memory_space<vmem>>, vector<8x1024xf32>,
    %c0_85 = arith.constant 0 : index
    %c0_86 = arith.constant 0 : index
    %91 = vector.load %arg9[%c0_85, %c0_86] : memref<8x1024xf32, #tpu.memory_space<vmem>>, vector<8x1024xf32>
    %c1009_i32_87 = arith.constant 1009 : i32
    %92 = tpu.dynamic_rotate %91 by %c1009_i32_87 dim 1 : vector<8x1024xf32>, i32 -> vector<8x1024xf32>
    %c6_88 = arith.constant 6 : index
    %c0_89 = arith.constant 0 : index
    %93 = vector.load %arg2[%c6_88, %c0_89] : memref<9x1024xf32, #tpu.memory_space<vmem>>, vector<1x1024xf32>
    %94 = vector.broadcast %93 : vector<1x1024xf32> to vector<8x1024xf32>
    %95 = arith.mulf %92, %94 : vector<8x1024xf32>
    %c48_90 = arith.constant 48 : index
    %c0_91 = arith.constant 0 : index
    %96 = vector.load %arg8[%c48_90, %c0_91] : memref<72x1024xf32, #tpu.memory_space<vmem>>, vector<8x1024xf32>
    tpu.vector_store %arg8[%c48_90, %c0_91], %95 {strides = array<i32>} : memref<72x1024xf32, #tpu.memory_space<vmem>>, vector<8x1024xf32>,
    %c0_92 = arith.constant 0 : index
    %c0_93 = arith.constant 0 : index
    %97 = vector.load %arg9[%c0_92, %c0_93] : memref<8x1024xf32, #tpu.memory_space<vmem>>, vector<8x1024xf32>
    %c1008_i32_94 = arith.constant 1008 : i32
    %98 = tpu.dynamic_rotate %97 by %c1008_i32_94 dim 1 : vector<8x1024xf32>, i32 -> vector<8x1024xf32>
    %c7_95 = arith.constant 7 : index
    %c0_96 = arith.constant 0 : index
    %99 = vector.load %arg2[%c7_95, %c0_96] : memref<9x1024xf32, #tpu.memory_space<vmem>>, vector<1x1024xf32>
    %100 = vector.broadcast %99 : vector<1x1024xf32> to vector<8x1024xf32>
    %101 = arith.mulf %98, %100 : vector<8x1024xf32>
    %c56_97 = arith.constant 56 : index
    %c0_98 = arith.constant 0 : index
    %102 = vector.load %arg8[%c56_97, %c0_98] : memref<72x1024xf32, #tpu.memory_space<vmem>>, vector<8x1024xf32>
    tpu.vector_store %arg8[%c56_97, %c0_98], %101 {strides = array<i32>} : memref<72x1024xf32, #tpu.memory_space<vmem>>, vector<8x1024xf32>,
    %c0_99 = arith.constant 0 : index
    %c0_100 = arith.constant 0 : index
    %103 = vector.load %arg9[%c0_99, %c0_100] : memref<8x1024xf32, #tpu.memory_space<vmem>>, vector<8x1024xf32>
    %c1007_i32_101 = arith.constant 1007 : i32
    %104 = tpu.dynamic_rotate %103 by %c1007_i32_101 dim 1 : vector<8x1024xf32>, i32 -> vector<8x1024xf32>
    %c8_102 = arith.constant 8 : index
    %c0_103 = arith.constant 0 : index
    %105 = vector.load %arg2[%c8_102, %c0_103] : memref<9x1024xf32, #tpu.memory_space<vmem>>, vector<1x1024xf32>
    %106 = vector.broadcast %105 : vector<1x1024xf32> to vector<8x1024xf32>
    %107 = arith.mulf %104, %106 : vector<8x1024xf32>
    %c64_104 = arith.constant 64 : index
    %c0_105 = arith.constant 0 : index
    %108 = vector.load %arg8[%c64_104, %c0_105] : memref<72x1024xf32, #tpu.memory_space<vmem>>, vector<8x1024xf32>
    tpu.vector_store %arg8[%c64_104, %c0_105], %107 {strides = array<i32>} : memref<72x1024xf32, #tpu.memory_space<vmem>>, vector<8x1024xf32>,
    %c0_106 = arith.constant 0 : index
    %c0_107 = arith.constant 0 : index
    %109 = vector.load %arg5[%c0_106, %c0_107] : memref<8x72xf32, #tpu.memory_space<vmem>>, vector<8x72xf32>
    %c0_108 = arith.constant 0 : index
    %c0_109 = arith.constant 0 : index
    %110 = vector.load %arg8[%c0_108, %c0_109] : memref<72x1024xf32, #tpu.memory_space<vmem>>, vector<72x1024xf32>
    %cst_110 = arith.constant dense<0.000000e+00> : vector<8x1024xf32>
    %111 = tpu.matmul %109, %110, %cst_110 {dimension_numbers = #tpu.dot_dimension_numbers<[1], [0], [0], [1], [0, 0, 1, 1], [], []>} : vector<8x72xf32>, vector<72x1024xf32>, vector<8x1024xf32> -> vector<8x1024xf32>
    %c0_111 = arith.constant 0 : index
    %c0_112 = arith.constant 0 : index
    %112 = vector.load %arg6[%c0_111, %c0_112] : memref<8x1xf32, #tpu.memory_space<vmem>>, vector<8x1xf32>
    %113 = vector.broadcast %112 : vector<8x1xf32> to vector<8x1024xf32>
    %114 = arith.addf %111, %113 : vector<8x1024xf32>
    %c0_113 = arith.constant 0 : index
    %c0_114 = arith.constant 0 : index
    %115 = vector.load %arg1[%c0_113, %c0_114] : memref<8x1024xf32, #tpu.memory_space<vmem>>, vector<8x1024xf32>
    %116 = arith.addf %114, %115 : vector<8x1024xf32>
    %cst_115 = arith.constant 0.000000e+00 : f32
    %117 = vector.broadcast %cst_115 : f32 to vector<8x1024xf32>
    %118 = arith.maximumf %116, %117 : vector<8x1024xf32>
    %c0_116 = arith.constant 0 : index
    %c0_117 = arith.constant 0 : index
    %119 = vector.load %arg7[%c0_116, %c0_117] : memref<8x1024xf32, #tpu.memory_space<vmem>>, vector<8x1024xf32>
    tpu.vector_store %arg7[%c0_116, %c0_117], %118 {strides = array<i32>} : memref<8x1024xf32, #tpu.memory_space<vmem>>, vector<8x1024xf32>,
    return
  }
  func.func @transform_0(%arg0: i32) -> (i32, i32) {
    %c0_i32 = arith.constant 0 : i32
    %c0_i32_0 = arith.constant 0 : i32
    return %c0_i32, %arg0 : i32, i32
  }
  func.func @transform_1(%arg0: i32) -> (i32, i32) {
    %c0_i32 = arith.constant 0 : i32
    %c0_i32_0 = arith.constant 0 : i32
    %c0_i32_1 = arith.constant 0 : i32
    return %c0_i32, %c0_i32_0 : i32, i32
  }
  func.func @transform_2(%arg0: i32) -> (i32, i32) {
    %c0_i32 = arith.constant 0 : i32
    %c0_i32_0 = arith.constant 0 : i32
    %c0_i32_1 = arith.constant 0 : i32
    return %c0_i32, %c0_i32_0 : i32, i32
  }
  func.func @transform_3(%arg0: i32) -> (i32, i32) {
    %c0_i32 = arith.constant 0 : i32
    %c0_i32_0 = arith.constant 0 : i32
    %c0_i32_1 = arith.constant 0 : i32
    return %c0_i32, %c0_i32_0 : i32, i32
  }
  func.func @transform_4(%arg0: i32) -> (i32, i32) {
    %c0_i32 = arith.constant 0 : i32
    %c0_i32_0 = arith.constant 0 : i32
    %c0_i32_1 = arith.constant 0 : i32
    return %c0_i32, %c0_i32_0 : i32, i32
  }
  func.func @transform_5(%arg0: i32) -> (i32, i32) {
    %c0_i32 = arith.constant 0 : i32
    %c0_i32_0 = arith.constant 0 : i32
    %c0_i32_1 = arith.constant 0 : i32
    return %c0_i32, %c0_i32_0 : i32, i32
  }
  func.func @transform_6(%arg0: i32) -> (i32, i32) {
    %c0_i32 = arith.constant 0 : i32
    %c0_i32_0 = arith.constant 0 : i32
    return %c0_i32, %arg0 : i32, i32
  }
}

</mosaic_0001>

<bundles_post_ra>
// kernel: basic_block_forward.1
= control target key start
LH: loop header
LB: loop body
LE: loop exit
PB: predicated region body
PF: predicated region fallthrough
CT: control target
= control target key end

     0   :  { %s2860_s21 = smov 0   ;;  %s4205_s0 = inlined_call_operand.vmem [shape: f32[8,2048], index: 0, kind: input, shape index: {}]   ;;  %s4206_s1 = inlined_call_operand.vmem [shape: f32[9,1024], index: 1, kind: input, shape index: {}]   ;;  %s4207_s2 = inlined_call_operand.vmem [shape: f32[8,72], index: 2, kind: input, shape index: {}]   ;;  %s4208_s3 = inlined_call_operand.vmem [shape: f32[8,1], index: 3, kind: input, shape index: {}]   ;;  %s4209_s4 = inlined_call_operand.vmem [shape: f32[8,72], index: 4, kind: input, shape index: {}]   ;;  %s4210_s5 = inlined_call_operand.vmem [shape: f32[8,1], index: 5, kind: input, shape index: {}]   ;;  %s4211_s6 = inlined_call_operand.vmem [shape: f32[8,2048], index: 6, kind: output, shape index: {}]  }
   0x1 LB: > { %s2613_s22 = sadd.s32 4294967295, %s2813_s21   ;;  %p2617_p0 = scmp.ge.s32.totalorder %s2813_s21, 1  ;;  %s2813_s21 = sphi %s2860_s21, %s16_s21  }
   0x2   : > { %p213_p1 = scmp.lt.s32.totalorder %s2813_s21, 3 }
   0x4   : > { %p214_p2 = pnand %p2617_p0, %p213_p1 }
   0x6   : > { %217 = sbr.rel (%p214_p2) target bundleno = 923 (0x39b), region = 44 }
   0xd   : > { %s2618_s23 = sshll.u32 %s2613_s22, 3  ;;  %s2815_s28 = smov 16   ;;  %v4212_v8 = vmov 0.0   ;;  %v279_v9 = vlaneseq  ;;  %v290_v10 = vld [vmem:[%s4206_s1] ss:$8 sm:$0xf] }
   0xe   : > { %p244_p3 = scmp.lt.s32.totalorder %s2618_s23, 15  ;;  %s2816_s29 = smov 17   ;;  %1242 = vmatprep.mubr.f32.mxu1 %v4212_v8  ;;  %1171 = vmatprep.mubr.f32.mxu0 %v4212_v8  ;;  %v291_v12 = vld [vmem:[%s4206_s1] ss:$8 sm:$0xf0]  ;;  %v2824_v48 = vmov 0  }
   0xf   : > { %s2817_s30 = smov 15   ;;  %s2818_s7 = smov 1   ;;  %v3019_v11 = vshrl.u32 %v279_v9, 7  ;;  %v2622_v13 = vld [vmem:[%s4206_s1 + $0x1] ss:$8 sm:$0xf]  ;;  %v3036_v16 = vor.u32 %v291_v12, %v290_v10  ;;  %2806 = vset.pattern.permute.xlu0 %v2824_v48 }
  0x10   : > { %s4267_s23 = smov (!%p244_p3, %s2618_s23), 15  ;;  %s2819_s8 = smov 127   ;;  %v2623_v14 = vld [vmem:[%s4206_s1 + $0x1] ss:$8 sm:$0xf0]  ;;  %v3034_v15 = vand.u32 127, %v279_v9 }
  0x11   : > { %s2619_s24 = sshll.u32 %s4267_s23, 3  ;;  %s2820_s9 = smov 113   ;;  %v3039_v17 = vsub.s32 3, %v3019_v11  ;;  %v3041_v18 = vor.u32 %v2623_v14, %v2622_v13  ;;  %v3044_v21 = vsub.s32 2, %v3019_v11  ;;  %v1097_v49 = vld [vmem:[%s4208_s3] sm:$0xff]  ;;  %v3118_v56 = vsub.s32 1, %v3019_v11 }
  0x12   : > { %s2876_s27 = scalar_lea.vmem %s4205_s0, %s2619_s24  ;;  %s2821_s10 = smov 112   ;;  %vm374_vm0 = vcmp.lt.s32.totalorder %v3034_v15, 16  ;;  %vm281_vm1 = vcmp.lt.s32.totalorder %v3034_v15, 17  ;;  %v2624_v31 = vld [vmem:[%s4206_s1 + $0x2] ss:$8 sm:$0xf] }
  0x13   : > { %v2879_v0 = vld [vmem:[%s2876_s27 + $0x10] sm:$0xff]  ;;  %v2886_v1 = vld [vmem:[%s2876_s27 + $0x18] sm:$0xff]  ;;  %v2893_v2 = vld [vmem:[%s2876_s27 + $0x8] sm:$0xff]  ;;  %s2822_s11 = smov 111   ;;  %v309_v22 = vrot.slane %v3036_v16, %v3039_v17  ;;  %v403_v23 = vrot.slane %v3041_v18, %v3039_v17  ;;  %v305_v28 = vrot.slane %v3036_v16, %v3044_v21  ;;  %v399_v33 = vrot.slane %v3041_v18, %v3044_v21  ;;  %s4186_s25 = scalar_lea.vmem %s4211_s6, %s2619_s24 }
  0x14   : > { %362 = vrot.lane.b32.xlu1 %v2879_v0, %s2815_s28  ;;  %267 = vrot.lane.b32.xlu0 %v2879_v0, %s2816_s29  ;;  %v2912_v3 = vld [vmem:[%s2876_s27] sm:$0xff]  ;;  %v2926_v5 = vld [vmem:[%s2876_s27 + $0x38] sm:$0xff]  ;;  %vm468_vm2 = vcmp.lt.s32.totalorder %v3034_v15, 15  ;;  %vm562_vm3 = vcmp.lt.s32.totalorder %v3034_v15, 1  ;;  %v301_v14 = vrot.slane %v3036_v16, %v3118_v56  ;;  %vm672_vm4 = vcmp.lt.s32.totalorder %v3034_v15, 127 }
  0x15   : > { %v2919_v4 = vld [vmem:[%s2876_s27 + $0x20] sm:$0xff]  ;;  %v2957_v6 = vld [vmem:[%s2876_s27 + $0x30] sm:$0xff]  ;;  %v2968_v7 = vld [vmem:[%s2876_s27 + $0x28] sm:$0xff]  ;;  %vm766_vm5 = vcmp.lt.s32.totalorder %v3034_v15, 113  ;;  %vm860_vm6 = vcmp.lt.s32.totalorder %v3034_v15, 112  ;;  %vm954_vm7 = vcmp.lt.s32.totalorder %v3034_v15, 111 }
  0x16   : > { %v2625_v32 = vld [vmem:[%s4206_s1 + $0x2] ss:$8 sm:$0xf0]  ;;  %v2626_v34 = vld [vmem:[%s4206_s1 + $0x3] ss:$8 sm:$0xf] }
  0x17   : > { %v2627_v35 = vld [vmem:[%s4206_s1 + $0x3] ss:$8 sm:$0xf0]  ;;  %v3090_v41 = vor.u32 %v2625_v32, %v2624_v31  ;;  %v2628_v61 = vld [vmem:[%s4206_s1 + $0x5] ss:$8 sm:$0xf] }
  0x18   : > { %364 = vrot.lane.b32.xlu1 %v2886_v1, %s2815_s28  ;;  %269 = vrot.lane.b32.xlu0 %v2886_v1, %s2816_s29  ;;  %v3094_v44 = vor.u32 %v2627_v35, %v2626_v34  ;;  %v2629_v62 = vld [vmem:[%s4206_s1 + $0x5] ss:$8 sm:$0xf0]  ;;  %v3148_v34 = vsub.s32 0, %v3019_v11  ;;  %vm1103_vm8 = vcmask 588800  }
  0x19   : > { %v497_v50 = vrot.slane %v3090_v41, %v3039_v17  ;;  %v493_v60 = vrot.slane %v3090_v41, %v3044_v21  ;;  %v2527_v15 = vld [vmem:[%s2876_s27 + $0x10] sm:$0xff] }
  0x1a   : > { %v591_v51 = vrot.slane %v3094_v44, %v3039_v17  ;;  %v587_v59 = vrot.slane %v3094_v44, %v3044_v21 }
  0x1c   : > { %360 = vrot.lane.b32.xlu1 %v2893_v2, %s2815_s28  ;;  %265 = vrot.lane.b32.xlu0 %v2893_v2, %s2816_s29 }
  0x20   : > { %458 = vrot.lane.b32.xlu1 %v2886_v1, %s2817_s30  ;;  %456 = vrot.lane.b32.xlu0 %v2879_v0, %s2817_s30 }
  0x24   : > { %552 = vrot.lane.b32.xlu1 %v2886_v1, %s2818_s7  ;;  %550 = vrot.lane.b32.xlu0 %v2879_v0, %s2818_s7 }
  0x28   : > { %548 = vrot.lane.b32.xlu1 %v2893_v2, %s2818_s7  ;;  %454 = vrot.lane.b32.xlu0 %v2893_v2, %s2817_s30 }
  0x2c   : > { %358 = vrot.lane.b32.xlu1 %v2912_v3, %s2815_s28  ;;  %263 = vrot.lane.b32.xlu0 %v2912_v3, %s2816_s29 }
  0x30   : > { %664 = vrot.lane.b32.xlu1 %v2919_v4, %s2819_s8  ;;  %662 = vrot.lane.b32.xlu0 %v2886_v1, %s2819_s8 }
  0x34   : > { %372 = vrot.lane.b32.xlu1 %v2926_v5, %s2815_s28  ;;  %277 = vrot.lane.b32.xlu0 %v2926_v5, %s2816_s29 }
  0x38   : > { %452 = vrot.lane.b32.xlu1 %v2912_v3, %s2817_s30  ;;  %660 = vrot.lane.b32.xlu0 %v2879_v0, %s2819_s8 }
  0x3c   : > { %756 = vrot.lane.b32.xlu1 %v2886_v1, %s2820_s9  ;;  %546 = vrot.lane.b32.xlu0 %v2912_v3, %s2818_s7 }
  0x40   : > { %850 = vrot.lane.b32.xlu1 %v2886_v1, %s2821_s10  ;;  %758 = vrot.lane.b32.xlu0 %v2919_v4, %s2820_s9 }
  0x44   : > { %466 = vrot.lane.b32.xlu1 %v2926_v5, %s2817_s30  ;;  %852 = vrot.lane.b32.xlu0 %v2919_v4, %s2821_s10 }
  0x48   : > { %754 = vrot.lane.b32.xlu1 %v2879_v0, %s2820_s9  ;;  %560 = vrot.lane.b32.xlu0 %v2926_v5, %s2818_s7 }
  0x4c   : > { %658 = vrot.lane.b32.xlu1 %v2893_v2, %s2819_s8  ;;  %848 = vrot.lane.b32.xlu0 %v2879_v0, %s2821_s10 }
  0x50   : > { %275 = vrot.lane.b32.xlu1 %v2957_v6, %s2816_s29  ;;  %656 = vrot.lane.b32.xlu0 %v2912_v3, %s2819_s8 }
  0x54   : > { %944 = vrot.lane.b32.xlu1 %v2886_v1, %s2822_s11  ;;  %370 = vrot.lane.b32.xlu0 %v2957_v6, %s2815_s28 }
  0x58   : > { %273 = vrot.lane.b32.xlu1 %v2968_v7, %s2816_s29  ;;  %946 = vrot.lane.b32.xlu0 %v2919_v4, %s2822_s11 }
  0x5c   : > { %942 = vrot.lane.b32.xlu1 %v2879_v0, %s2822_s11  ;;  %368 = vrot.lane.b32.xlu0 %v2968_v7, %s2815_s28 }
  0x60   : > { %846 = vrot.lane.b32.xlu1 %v2893_v2, %s2821_s10  ;;  %752 = vrot.lane.b32.xlu0 %v2893_v2, %s2820_s9 }
  0x64   : > { %844 = vrot.lane.b32.xlu1 %v2912_v3, %s2821_s10  ;;  %750 = vrot.lane.b32.xlu0 %v2912_v3, %s2820_s9 }
  0x68   : > { %558 = vrot.lane.b32.xlu1 %v2957_v6, %s2818_s7  ;;  %464 = vrot.lane.b32.xlu0 %v2957_v6, %s2817_s30 }
  0x6c   : > { %556 = vrot.lane.b32.xlu1 %v2968_v7, %s2818_s7  ;;  %462 = vrot.lane.b32.xlu0 %v2968_v7, %s2817_s30 }
  0x70   : > { %366 = vrot.lane.b32.xlu1 %v2919_v4, %s2815_s28  ;;  %271 = vrot.lane.b32.xlu0 %v2919_v4, %s2816_s29 }
  0x74   : > { %940 = vrot.lane.b32.xlu1 %v2893_v2, %s2822_s11  ;;  %670 = vrot.lane.b32.xlu0 %v2926_v5, %s2819_s8 }
  0x78   : > { %938 = vrot.lane.b32.xlu1 %v2912_v3, %s2822_s11  ;;  %668 = vrot.lane.b32.xlu0 %v2957_v6, %s2819_s8 }
  0x7c   : > { %554 = vrot.lane.b32.xlu1 %v2919_v4, %s2818_s7  ;;  %460 = vrot.lane.b32.xlu0 %v2919_v4, %s2817_s30 }
  0x80   : > { %858 = vrot.lane.b32.xlu1 %v2926_v5, %s2821_s10  ;;  %764 = vrot.lane.b32.xlu0 %v2926_v5, %s2820_s9 }
  0x84   : > { %856 = vrot.lane.b32.xlu1 %v2957_v6, %s2821_s10  ;;  %762 = vrot.lane.b32.xlu0 %v2957_v6, %s2820_s9 }
  0x86   : > { %v363_v19 = vpop.permute.xlu1 %362  ;;  %v268_v20 = vpop.permute.xlu0 %267 }
  0x88   : > { %952 = vrot.lane.b32.xlu1 %v2926_v5, %s2822_s11  ;;  %666 = vrot.lane.b32.xlu0 %v2968_v7, %s2819_s8 }
  0x8a   : > { %v3056_v24 = vpop.permute.xlu1 %364  ;;  %v3058_v25 = vpop.permute.xlu0 %269 }
  0x8b   : > { %v286_v26 = vsel %vm281_vm1, %v268_v20, %v3058_v25  ;;  %v379_v27 = vsel %vm374_vm0, %v363_v19, %v3056_v24 }
  0x8c   : > { %760 = vrot.lane.b32.xlu1 %v2968_v7, %s2820_s9  ;;  %950 = vrot.lane.b32.xlu0 %v2957_v6, %s2822_s11  ;;  %v337_v29 = vmul.f32 %v309_v22, %v286_v26  ;;  %v431_v30 = vmul.f32 %v403_v23, %v379_v27  ;;  %v3136_v22 = vor.u32 %v2629_v62, %v2628_v61  ;;  %v2630_v61 = vld [vmem:[%s4206_s1 + $0x6] ss:$8 sm:$0xf] }
  0x8d   : > { %v395_v23 = vrot.slane %v3041_v18, %v3118_v56  ;;  %v2631_v62 = vld [vmem:[%s4206_s1 + $0x6] ss:$8 sm:$0xf0] }
  0x8e   : > { %v361_v36 = vpop.permute.xlu1 %360  ;;  %v266_v37 = vpop.permute.xlu0 %265  ;;  %v2676_v38 = vpack.c.bf16 %v431_v30, %v337_v29  ;;  %v701_v31 = vrot.slane %v3136_v22, %v3039_v17 }
  0x8f   : > { %v380_v39 = vsel %vm374_vm0, %v361_v36, %v363_v19  ;;  %v287_v40 = vsel %vm281_vm1, %v266_v37, %v268_v20 }
  0x90   : > { %948 = vrot.lane.b32.xlu1 %v2968_v7, %s2822_s11  ;;  %2677 = vmatprep.subr.bf16.mxu1 %v2676_v38  ;;  %v336_v42 = vmul.f32 %v305_v28, %v287_v40  ;;  %v430_v43 = vmul.f32 %v399_v33, %v380_v39 }
  0x91   : > { %854 = vrot.lane.b32.xlu0 %v2968_v7, %s2821_s10 }
  0x92   : > { %v3098_v45 = vpop.permute.xlu1 %458  ;;  %v457_v46 = vpop.permute.xlu0 %456  ;;  %v2678_v47 = vpack.c.bf16 %v430_v43, %v336_v42  ;;  %v391_v42 = vrot.slane %v3041_v18, %v3148_v34 }
  0x93   : > { %v473_v52 = vsel %vm468_vm2, %v457_v46, %v3098_v45 }
  0x94   : > { %2679 = vmatpush1.bf16.msra.mxu1 %v2678_v47  ;;  %v525_v57 = vmul.f32 %v497_v50, %v473_v52  ;;  %v697_v50 = vrot.slane %v3136_v22, %v3044_v21 }
  0x95   : > { %1100 = vperm.xlu0 %2806, %v1097_v49  }
  0x96   : > { %v3112_v53 = vpop.permute.xlu1 %552  ;;  %v551_v54 = vpop.permute.xlu0 %550 }
  0x97   : > { %v567_v55 = vsel %vm562_vm3, %v551_v54, %v3112_v53 }
  0x98   : > { %v619_v58 = vmul.f32 %v591_v51, %v567_v55 }
  0x9a   : > { %v549_v63 = vpop.permute.xlu1 %548  ;;  %v455_v9 = vpop.permute.xlu0 %454  ;;  %v2680_v10 = vpack.c.bf16 %v619_v58, %v525_v57  ;;  %v489_v58 = vrot.slane %v3090_v41, %v3118_v56 }
  0x9b   : > { %v568_v12 = vsel %vm562_vm3, %v549_v63, %v551_v54  ;;  %v474_v13 = vsel %vm468_vm2, %v455_v9, %v457_v46 }
  0x9c   : > { %v618_v19 = vmul.f32 %v587_v59, %v568_v12  ;;  %v524_v20 = vmul.f32 %v493_v60, %v474_v13  ;;  %2681 = vmatprep.subr.bf16.mxu1 %v2680_v10  ;;  %v583_v60 = vrot.slane %v3094_v44, %v3118_v56  ;;  %v2632_v12 = vld [vmem:[%s4206_s1 + $0x7] ss:$8 sm:$0xf] }
  0x9d   : > { %v2633_v13 = vld [vmem:[%s4206_s1 + $0x7] ss:$8 sm:$0xf0] }
  0x9e   : > { %v359_v26 = vpop.permute.xlu1 %358  ;;  %v264_v27 = vpop.permute.xlu0 %263  ;;  %v2682_v28 = vpack.c.bf16 %v618_v19, %v524_v20 }
  0x9f   : > { %v288_v29 = vsel %vm281_vm1, %v264_v27, %v266_v37  ;;  %v381_v30 = vsel %vm374_vm0, %v359_v26, %v361_v36  ;;  %v297_v36 = vrot.slane %v3036_v16, %v3148_v34 }
  0xa0   : > { %2683 = vmatpush1.bf16.msra.mxu1 %v2682_v28  ;;  %v335_v32 = vmul.f32 %v301_v14, %v288_v29  ;;  %v429_v33 = vmul.f32 %v395_v23, %v381_v30  ;;  %v3195_v28 = vor.u32 %v2631_v62, %v2630_v61 }
  0xa2   : > { %v3150_v35 = vpop.permute.xlu1 %664  ;;  %v663_v38 = vpop.permute.xlu0 %662  ;;  %v2660_v39 = vpack.c.bf16 %v429_v33, %v335_v32  ;;  %v795_v32 = vrot.slane %v3195_v28, %v3039_v17 }
  0xa3   : > { %v676_v37 = vsel %vm672_vm4, %v663_v38, %v3150_v35 }
  0xa4   : > { %v729_v40 = vmul.f32 %v701_v31, %v676_v37  ;;  %2661 = vmatprep.subr.bf16.mxu0 %v2660_v39 }
  0xa6   : > { %v3159_v43 = vpop.permute.xlu1 %372  ;;  %v3161_v46 = vpop.permute.xlu0 %277  ;;  %v2684_v47 = vpack.c.bf16 %v729_v40, %v2886_v1  ;;  %v485_v40 = vrot.slane %v3090_v41, %v3148_v34 }
  0xa7   : > { %v382_v48 = vsel %vm374_vm0, %v3159_v43, %v359_v26  ;;  %v289_v49 = vsel %vm281_vm1, %v3161_v46, %v264_v27 }
  0xa8   : > { %2685 = vmatprep.subr.bf16.mxu1 %v2684_v47  ;;  %v334_v51 = vmul.f32 %v297_v36, %v289_v49  ;;  %v428_v52 = vmul.f32 %v391_v42, %v382_v48  ;;  %v579_v42 = vrot.slane %v3094_v44, %v3148_v34 }
  0xaa   : > { %v453_v54 = vpop.permute.xlu1 %452  ;;  %v661_v55 = vpop.permute.xlu0 %660  ;;  %v2662_v57 = vpack.c.bf16 %v428_v52, %v334_v51  ;;  %v791_v51 = vrot.slane %v3195_v28, %v3044_v21 }
  0xab   : > { %v677_v1 = vsel %vm672_vm4, %v661_v55, %v663_v38  ;;  %v475_v10 = vsel %vm468_vm2, %v453_v54, %v455_v9  ;;  %v3197_v9 = vor.u32 %v2633_v13, %v2632_v12 }
  0xac   : > { %v728_v59 = vmul.f32 %v697_v50, %v677_v1  ;;  %2663 = vmatpush1.bf16.msra.mxu0 %v2662_v57  ;;  %v523_v26 = vmul.f32 %v489_v58, %v475_v10  ;;  %v693_v58 = vrot.slane %v3136_v22, %v3118_v56 }
  0xae   : > { %v757_v14 = vpop.permute.xlu1 %756  ;;  %v547_v19 = vpop.permute.xlu0 %546  ;;  %v2686_v20 = vpack.c.bf16 %v728_v59, %v2879_v0  ;;  %v889_v0 = vrot.slane %v3197_v9, %v3039_v17 }
  0xaf   : > { %v569_v23 = vsel %vm562_vm3, %v547_v19, %v549_v63 }
  0xb0   : > { %v617_v27 = vmul.f32 %v583_v60, %v569_v23  ;;  %2687 = vmatpush1.bf16.msra.mxu1 %v2686_v20  ;;  %v689_v23 = vrot.slane %v3136_v22, %v3148_v34 }
  0xb2   : > { %v851_v29 = vpop.permute.xlu1 %850  ;;  %v3200_v30 = vpop.permute.xlu0 %758  ;;  %v2664_v31 = vpack.c.bf16 %v617_v27, %v523_v26  ;;  %v2635_v26 = vld [vmem:[%s4206_s1 + $0x40] ss:$8 sm:$0xf0] }
  0xb3   : > { %v770_v63 = vsel %vm766_vm5, %v757_v14, %v3200_v30 }
  0xb4   : > { %2665 = vmatprep.subr.bf16.mxu0 %v2664_v31  ;;  %v823_v37 = vmul.f32 %v795_v32, %v770_v63 }
  0xb6   : > { %v3210_v33 = vpop.permute.xlu1 %466  ;;  %v3212_v38 = vpop.permute.xlu0 %852 }
  0xb7   : > { %v864_v39 = vsel %vm860_vm6, %v851_v29, %v3212_v38  ;;  %v476_v47 = vsel %vm468_vm2, %v3210_v33, %v453_v54  ;;  %v885_v54 = vrot.slane %v3197_v9, %v3044_v21 }
  0xb8   : > { %v917_v36 = vmul.f32 %v889_v0, %v864_v39  ;;  %v522_v57 = vmul.f32 %v485_v40, %v476_v47 }
  0xba   : > { %v3224_v48 = vpop.permute.xlu1 %754  ;;  %v3226_v49 = vpop.permute.xlu0 %560  ;;  %v2688_v50 = vpack.c.bf16 %v917_v36, %v823_v37  ;;  %v3262_v36 = vsub.s32 7, %v3019_v11 }
  0xbb   : > { %v570_v52 = vsel %vm562_vm3, %v3226_v49, %v547_v19  ;;  %v771_v59 = vsel %vm766_vm5, %v3224_v48, %v757_v14  ;;  %v2634_v14 = vld [vmem:[%s4206_s1 + $0x40] ss:$8 sm:$0xf] }
  0xbc   : > { %v616_v1 = vmul.f32 %v579_v42, %v570_v52  ;;  %2689 = vmatprep.subr.bf16.mxu1 %v2688_v50  ;;  %v822_v13 = vmul.f32 %v791_v51, %v771_v59  ;;  %v3258_v63 = vor.u32 %v2635_v26, %v2634_v14  ;;  %v3265_v42 = vsub.s32 6, %v3019_v11 }
  0xbd   : > { %v419_v47 = vrot.slane %v3041_v18, %v3262_v36  ;;  %v325_v52 = vrot.slane %v3036_v16, %v3262_v36 }
  0xbe   : > { %v659_v60 = vpop.permute.xlu1 %658  ;;  %v849_v61 = vpop.permute.xlu0 %848  ;;  %v2666_v62 = vpack.c.bf16 %v616_v1, %v522_v57  ;;  %v321_v57 = vrot.slane %v3036_v16, %v3265_v42  ;;  %v415_v59 = vrot.slane %v3041_v18, %v3265_v42 }
  0xbf   : > { %v678_v10 = vsel %vm672_vm4, %v659_v60, %v661_v55  ;;  %v865_v12 = vsel %vm860_vm6, %v849_v61, %v851_v29 }
  0xc0   : > { %v727_v19 = vmul.f32 %v693_v58, %v678_v10  ;;  %v916_v20 = vmul.f32 %v885_v54, %v865_v12  ;;  %2667 = vmatpush1.bf16.msra.mxu0 %v2666_v62 }
  0xc2   : > { %v276_v27 = vpop.permute.xlu1 %275  ;;  %v3252_v55 = vpop.permute.xlu0 %656  ;;  %v2668_v29 = vpack.c.bf16 %v727_v19, %v2893_v2  ;;  %v2690_v31 = vpack.c.bf16 %v916_v20, %v822_v13  ;;  %v983_v2 = vrot.slane %v3258_v63, %v3039_v17 }
  0xc3   : > { %v679_v32 = vsel %vm672_vm4, %v3252_v55, %v659_v60  ;;  %v282_v58 = vsel %vm281_vm1, %v276_v27, %v3161_v46  ;;  %v881_v46 = vrot.slane %v3197_v9, %v3118_v56 }
  0xc4   : > { %v726_v0 = vmul.f32 %v689_v23, %v679_v32  ;;  %2669 = vmatprep.subr.bf16.mxu0 %v2668_v29  ;;  %2691 = vmatpush1.bf16.msra.mxu1 %v2690_v31  ;;  %v341_v13 = vmul.f32 %v325_v52, %v282_v58  ;;  %v787_v23 = vrot.slane %v3195_v28, %v3118_v56  ;;  %v3313_v29 = vld [vmem:[%s4207_s2] sm:$0xff] }
  0xc5   : > { %v783_v52 = vrot.slane %v3195_v28, %v3148_v34 }
  0xc6   : > { %v945_v39 = vpop.permute.xlu1 %944  ;;  %v371_v37 = vpop.permute.xlu0 %370  ;;  %v2670_v40 = vpack.c.bf16 %v726_v0, %v2912_v3 }
  0xc7   : > { %v375_v50 = vsel %vm374_vm0, %v371_v37, %v3159_v43  ;;  %v979_v43 = vrot.slane %v3258_v63, %v3044_v21 }
  0xc8   : > { %2671 = vmatpush1.bf16.msra.mxu0 %v2670_v40  ;;  %v435_v60 = vmul.f32 %v419_v47, %v375_v50 }
  0xca   : > { %v3275_v3 = vpop.permute.xlu1 %273  ;;  %v3277_v51 = vpop.permute.xlu0 %946  ;;  %v2708_v31 = vpack.c.bf16 %v435_v60, %v341_v13  ;;  %v513_v60 = vrot.slane %v3090_v41, %v3262_v36 }
  0xcb   : > { %v958_v1 = vsel %vm954_vm7, %v945_v39, %v3277_v51  ;;  %v283_v62 = vsel %vm281_vm1, %v3275_v3, %v276_v27 }
  0xcc   : > { %v1011_v54 = vmul.f32 %v983_v2, %v958_v1  ;;  %v340_v14 = vmul.f32 %v321_v57, %v283_v62  ;;  %v877_v2 = vrot.slane %v3197_v9, %v3148_v34 }
  0xce   : > { %v3296_v10 = vpop.permute.xlu1 %942  ;;  %1194 = vmatprep.subr.mxu1 %v1011_v54  ;;  %v3298_v12 = vpop.permute.xlu0 %368 }
  0xcf   : > { %v959_v19 = vsel %vm954_vm7, %v3296_v10, %v945_v39  ;;  %v376_v20 = vsel %vm374_vm0, %v3298_v12, %v371_v37 }
  0xd0   : > { %v1010_v26 = vmul.f32 %v979_v43, %v959_v19  ;;  %v434_v27 = vmul.f32 %v415_v59, %v376_v20  ;;  %v607_v59 = vrot.slane %v3094_v44, %v3262_v36 }
  0xd2   : > { %v2710_v32 = vpack.c.bf16 %v434_v27, %v340_v14  ;;  %v847_v0 = vpop.permute.xlu1 %846  ;;  %1195 = vmatpush1.msra.mxu1 %v1010_v26  ;;  %v753_v39 = vpop.permute.xlu0 %752  ;;  %v603_v26 = vrot.slane %v3094_v44, %v3265_v42  ;;  %v509_v27 = vrot.slane %v3090_v41, %v3265_v42 }
  0xd3   : > { %v866_v37 = vsel %vm860_vm6, %v847_v0, %v849_v61  ;;  %v772_v40 = vsel %vm766_vm5, %v753_v39, %v3224_v48  ;;  %2709 = vmatprep.subr.bf16.mxu1 %v2708_v31  ;;  %2637 = vmatmul.mubr.msk.f32.vlgmr.msra.gmra.mrb[0].mxu1 %vm1103_vm8, %v3313_v29 }
  0xd4   : > { %v915_v47 = vmul.f32 %v881_v46, %v866_v37  ;;  %v821_v50 = vmul.f32 %v787_v23, %v772_v40  ;;  %2711 = vmatpush1.bf16.msra.mxu1 %v2710_v32  ;;  %1384 = vmatprep.mubr.f32.mxu1 %v4212_v8  ;;  %v3356_v40 = vsub.s32 4, %v3019_v11 }
  0xd6   : > { %v3327_v61 = vpop.permute.xlu1 %844  ;;  %v3329_v57 = vpop.permute.xlu0 %750  ;;  %v2672_v48 = vpack.c.bf16 %v915_v47, %v821_v50 }
  0xd7   : > { %v867_v1 = vsel %vm860_vm6, %v3327_v61, %v847_v0  ;;  %v773_v58 = vsel %vm766_vm5, %v3329_v57, %v753_v39 }
  0xd8   : > { %v914_v54 = vmul.f32 %v877_v2, %v867_v1  ;;  %v820_v43 = vmul.f32 %v783_v52, %v773_v58  ;;  %2673 = vmatprep.subr.bf16.mxu0 %v2672_v48  ;;  %v3359_v2 = vsub.s32 5, %v3019_v11  ;;  %v975_v48 = vrot.slane %v3258_v63, %v3118_v56 }
  0xd9   : > { %v717_v1 = vrot.slane %v3136_v22, %v3262_v36  ;;  %v407_v58 = vrot.slane %v3041_v18, %v3356_v40 }
  0xda   : > { %v559_v62 = vpop.permute.xlu1 %558  ;;  %v465_v46 = vpop.permute.xlu0 %464  ;;  %v2674_v13 = vpack.c.bf16 %v914_v54, %v820_v43  ;;  %v411_v54 = vrot.slane %v3041_v18, %v3359_v2 }
  0xdb   : > { %v563_v19 = vsel %vm562_vm3, %v559_v62, %v3226_v49  ;;  %v469_v20 = vsel %vm468_vm2, %v465_v46, %v3210_v33 }
  0xdc   : > { %v623_v23 = vmul.f32 %v607_v59, %v563_v19  ;;  %v529_v14 = vmul.f32 %v513_v60, %v469_v20  ;;  %2675 = vmatpush1.bf16.msra.mxu0 %v2674_v13  ;;  %v313_v59 = vrot.slane %v3036_v16, %v3356_v40  ;;  %v317_v60 = vrot.slane %v3036_v16, %v3359_v2 }
  0xdd   : > { %v971_v20 = vrot.slane %v3258_v63, %v3148_v34 }
  0xde   : > { %v557_v31 = vpop.permute.xlu1 %556  ;;  %v463_v32 = vpop.permute.xlu0 %462  ;;  %v2712_v0 = vpack.c.bf16 %v623_v23, %v529_v14 }
  0xdf   : > { %v564_v39 = vsel %vm562_vm3, %v557_v31, %v559_v62  ;;  %v470_v49 = vsel %vm468_vm2, %v463_v32, %v465_v46 }
  0xe0   : > { %v622_v37 = vmul.f32 %v603_v26, %v564_v39  ;;  %v528_v33 = vmul.f32 %v509_v27, %v470_v49  ;;  %2713 = vmatprep.subr.bf16.mxu1 %v2712_v0  ;;  %v595_v49 = vrot.slane %v3094_v44, %v3356_v40 }
  0xe2   : > { %v2714_v47 = vpack.c.bf16 %v622_v37, %v528_v33  ;;  %v367_v50 = vpop.permute.xlu1 %366  ;;  %v272_v52 = vpop.permute.xlu0 %271  ;;  %v599_v37 = vrot.slane %v3094_v44, %v3359_v2  ;;  %v811_v44 = vrot.slane %v3195_v28, %v3262_v36 }
  0xe3   : > { %v377_v11 = vsel %vm374_vm0, %v367_v50, %v3298_v12  ;;  %v378_v43 = vsel %vm374_vm0, %v3056_v24, %v367_v50  ;;  %v284_v18 = vsel %vm281_vm1, %v272_v52, %v3275_v3  ;;  %v285_v12 = vsel %vm281_vm1, %v3058_v25, %v272_v52 }
  0xe4   : > { %2715 = vmatpush1.bf16.msra.mxu1 %v2714_v47  ;;  %v713_v3 = vrot.slane %v3136_v22, %v3265_v42  ;;  %v432_v23 = vmul.f32 %v407_v58, %v378_v43  ;;  %v433_v14 = vmul.f32 %v411_v54, %v377_v11  ;;  %v338_v26 = vmul.f32 %v313_v59, %v285_v12 }
  0xe5   : > { %v339_v25 = vmul.f32 %v317_v60, %v284_v18  ;;  %v501_v50 = vrot.slane %v3090_v41, %v3356_v40  ;;  %v905_v52 = vrot.slane %v3197_v9, %v3262_v36 }
  0xe6   : > { %v941_v62 = vpop.permute.xlu1 %940  ;;  %v671_v46 = vpop.permute.xlu0 %670 }
  0xe7   : > { %v960_v24 = vsel %vm954_vm7, %v941_v62, %v3296_v10  ;;  %v680_v13 = vsel %vm672_vm4, %v671_v46, %v3252_v55  ;;  %v2692_v11 = vpack.c.bf16 %v433_v14, %v339_v25 }
  0xe8   : > { %v1009_v19 = vmul.f32 %v975_v48, %v960_v24  ;;  %v733_v16 = vmul.f32 %v717_v1, %v680_v13  ;;  %v2694_v48 = vpack.c.bf16 %v432_v23, %v338_v26 }
  0xea   : > { %v939_v27 = vpop.permute.xlu1 %938  ;;  %1123 = vmatprep.subr.mxu0 %v1009_v19  ;;  %v669_v0 = vpop.permute.xlu0 %668  ;;  %v2716_v10 = vpack.c.bf16 %v733_v16, %v2926_v5  ;;  %v505_v5 = vrot.slane %v3090_v41, %v3359_v2  ;;  %v901_v16 = vrot.slane %v3197_v9, %v3265_v42 }
  0xeb   : > { %v961_v55 = vsel %vm954_vm7, %v939_v27, %v941_v62  ;;  %v673_v39 = vsel %vm672_vm4, %v669_v0, %v671_v46 }
  0xec   : > { %v1008_v33 = vmul.f32 %v971_v20, %v961_v55  ;;  %v732_v47 = vmul.f32 %v713_v3, %v673_v39  ;;  %2717 = vmatprep.subr.bf16.mxu1 %v2716_v10  ;;  %v807_v20 = vrot.slane %v3195_v28, %v3265_v42  ;;  %v705_v55 = vrot.slane %v3136_v22, %v3356_v40 }
  0xed   : > { %v709_v39 = vrot.slane %v3136_v22, %v3359_v2  ;;  %v995_v22 = vrot.slane %v3258_v63, %v3265_v42 }
  0xee   : > { %v2718_v1 = vpack.c.bf16 %v732_v47, %v2957_v6  ;;  %v555_v58 = vpop.permute.xlu1 %554  ;;  %1124 = vmatpush1.msra.mxu0 %v1008_v33  ;;  %v461_v54 = vpop.permute.xlu0 %460 }
  0xef   : > { %v565_v43 = vsel %vm562_vm3, %v555_v58, %v557_v31  ;;  %v566_v41 = vsel %vm562_vm3, %v3112_v53, %v555_v58  ;;  %v471_v59 = vsel %vm468_vm2, %v461_v54, %v463_v32  ;;  %v472_v6 = vsel %vm468_vm2, %v3098_v45, %v461_v54  ;;  %2636 = vmatmul.mubr.msk.f32.vlgmr.msra.gmra.mrb[0].mxu0 %vm1103_vm8, %v3313_v29 }
  0xf0   : > { %v620_v60 = vmul.f32 %v595_v49, %v566_v41  ;;  %v621_v62 = vmul.f32 %v599_v37, %v565_v43  ;;  %v526_v46 = vmul.f32 %v501_v50, %v472_v6  ;;  %v527_v18 = vmul.f32 %v505_v5, %v471_v59  ;;  %2693 = vmatprep.subr.bf16.mxu0 %v2692_v11 }
  0xf1   : > { %2695 = vmatpush1.bf16.msra.mxu0 %v2694_v48  ;;  %2719 = vmatpush1.bf16.msra.mxu1 %v2718_v1  ;;  %v987_v41 = vrot.slane %v3258_v63, %v3356_v40  ;;  %v897_v59 = vrot.slane %v3197_v9, %v3359_v2 }
  0xf2   : > { %v2698_v31 = vpack.c.bf16 %v620_v60, %v526_v46  ;;  %v859_v12 = vpop.permute.xlu1 %858  ;;  %v765_v53 = vpop.permute.xlu0 %764  ;;  %v2696_v24 = vpack.c.bf16 %v621_v62, %v527_v18  ;;  %1313 = vmatprep.mubr.f32.mxu0 %v4212_v8  ;;  %v991_v46 = vrot.slane %v3258_v63, %v3359_v2 }
  0xf3   : > { %v868_v45 = vsel %vm860_vm6, %v859_v12, %v3327_v61  ;;  %v774_v32 = vsel %vm766_vm5, %v765_v53, %v3329_v57  ;;  %v999_v57 = vrot.slane %v3258_v63, %v3262_v36 }
  0xf4   : > { %v921_v13 = vmul.f32 %v905_v52, %v868_v45  ;;  %v827_v19 = vmul.f32 %v811_v44, %v774_v32  ;;  %2697 = vmatprep.subr.bf16.mxu0 %v2696_v24 }
  0xf5   : > { %2699 = vmatpush1.bf16.msra.mxu0 %v2698_v31 }
  0xf6   : > { %v857_v3 = vpop.permute.xlu1 %856  ;;  %v763_v23 = vpop.permute.xlu0 %762  ;;  %v2720_v14 = vpack.c.bf16 %v921_v13, %v827_v19 }
  0xf7   : > { %v861_v61 = vsel %vm860_vm6, %v857_v3, %v859_v12  ;;  %v767_v26 = vsel %vm766_vm5, %v763_v23, %v765_v53 }
  0xf8   : > { %v920_v25 = vmul.f32 %v901_v16, %v861_v61  ;;  %v826_v10 = vmul.f32 %v807_v20, %v767_v26  ;;  %2721 = vmatprep.subr.bf16.mxu1 %v2720_v14 }
  0xfa   : > { %v2722_v49 = vpack.c.bf16 %v920_v25, %v826_v10  ;;  %v953_v37 = vpop.permute.xlu1 %952  ;;  %v667_v33 = vpop.permute.xlu0 %666 }
  0xfb   : > { %v962_v47 = vsel %vm954_vm7, %v953_v37, %v939_v27  ;;  %v674_v50 = vsel %vm672_vm4, %v667_v33, %v669_v0  ;;  %v675_v5 = vsel %vm672_vm4, %v3150_v35, %v667_v33  ;;  %v803_v0 = vrot.slane %v3195_v28, %v3359_v2 }
  0xfc   : > { %v1015_v52 = vmul.f32 %v999_v57, %v962_v47  ;;  %v730_v48 = vmul.f32 %v705_v55, %v675_v5  ;;  %v731_v1 = vmul.f32 %v709_v39, %v674_v50  ;;  %2723 = vmatpush1.bf16.msra.mxu1 %v2722_v49 }
  0xfe   : > { %v2702_v58 = vpack.c.bf16 %v730_v48, %v2919_v4  ;;  %v761_v54 = vpop.permute.xlu1 %760  ;;  %1336 = vmatprep.subr.mxu1 %v1015_v52  ;;  %v951_v11 = vpop.permute.xlu0 %950  ;;  %v2700_v27 = vpack.c.bf16 %v731_v1, %v2968_v7  ;;  %v799_v4 = vrot.slane %v3195_v28, %v3356_v40  ;;  %v893_v7 = vrot.slane %v3197_v9, %v3356_v40 }
  0xff   : > { %v955_v35 = vsel %vm954_vm7, %v951_v11, %v953_v37  ;;  %v768_v44 = vsel %vm766_vm5, %v761_v54, %v763_v23  ;;  %v769_v6 = vsel %vm766_vm5, %v3200_v30, %v761_v54 }
 0x100   : > { %v1014_v43 = vmul.f32 %v995_v22, %v955_v35  ;;  %2701 = vmatprep.subr.bf16.mxu0 %v2700_v27  ;;  %v825_v62 = vmul.f32 %v803_v0, %v768_v44  ;;  %v824_v63 = vmul.f32 %v799_v4, %v769_v6  ;;  %v1439_v4 = vld [vmem:[%s4206_s1] ss:$8 sm:$0xf]  ;;  %v2641_v6 = vld [vmem:[%s4206_s1 + $0x1] ss:$8 sm:$0xf0] }
 0x101   : > { %2703 = vmatpush1.bf16.msra.mxu0 %v2702_v58 }
 0x102   : > { %v949_v60 = vpop.permute.xlu1 %948  ;;  %1337 = vmatpush1.msra.mxu1 %v1014_v43 }
 0x103   : > { %v957_v28 = vsel %vm954_vm7, %v3277_v51, %v949_v60  ;;  %v855_v18 = vpop.permute.xlu0 %854  ;;  %2639 = vmatmul.mubr.msk.f32.vlgmr.msra.gmra.mrb[2].mxu1 %vm1103_vm8, %v3313_v29  ;;  %v956_v9 = vsel %vm954_vm7, %v949_v60, %v951_v11  ;;  %v2232_v11 = vld [vmem:[%s4210_s5] sm:$0xff] }
 0x104   : > { %v1012_v31 = vmul.f32 %v987_v41, %v957_v28  ;;  %v862_v30 = vsel %vm860_vm6, %v855_v18, %v857_v3  ;;  %v863_v12 = vsel %vm860_vm6, %v3212_v38, %v855_v18  ;;  %2376 = vmatprep.mubr.f32.mxu1 %v4212_v8  ;;  %v1013_v24 = vmul.f32 %v991_v46, %v956_v9 }
 0x105   : > { %v918_v53 = vmul.f32 %v893_v7, %v863_v12  ;;  %v919_v51 = vmul.f32 %v897_v59, %v862_v30  ;;  %v1440_v7 = vld [vmem:[%s4206_s1] ss:$8 sm:$0xf0]  ;;  %v2640_v59 = vld [vmem:[%s4206_s1 + $0x1] ss:$8 sm:$0xf] }
 0x106   : > { %v3675_v46 = vor.u32 %v1440_v7, %v1439_v4  ;;  %v3677_v28 = vor.u32 %v2641_v6, %v2640_v59  ;;  %v2645_v4 = vld [vmem:[%s4206_s1 + $0x3] ss:$8 sm:$0xf0]  ;;  %v2643_v7 = vld [vmem:[%s4206_s1 + $0x2] ss:$8 sm:$0xf0] }
 0x107   : > { %v2706_v45 = vpack.c.bf16 %v918_v53, %v824_v63  ;;  %v2704_v32 = vpack.c.bf16 %v919_v51, %v825_v62 }
 0x108   : > { %v1542_v30 = vrot.slane %v3677_v28, %v3118_v56  ;;  %v1458_v51 = vrot.slane %v3675_v46, %v3039_v17 }
 0x109   : > { %2705 = vmatprep.subr.bf16.mxu0 %v2704_v32 }
 0x10a   : > { %2707 = vmatpush1.bf16.msra.mxu0 %v2706_v45 }
 0x10b   : > { %1265 = vmatprep.subr.mxu0 %v1013_v24  ;;  %v1546_v24 = vrot.slane %v3677_v28, %v3044_v21 }
 0x10e   : > { %1266 = vmatpush1.msra.mxu0 %v1012_v31  ;;  %v1450_v31 = vrot.slane %v3675_v46, %v3118_v56 }
 0x10f   : > { %2638 = vmatmul.mubr.msk.f32.vlgmr.msra.gmra.mrb[2].mxu0 %vm1103_vm8, %v3313_v29 }
 0x110   : > { %2305 = vmatprep.mubr.f32.mxu0 %v4212_v8  ;;  %v1554_v8 = vrot.slane %v3677_v28, %v3356_v40 }
 0x114   : > { %v3492_v13 = vpop.permute.xlu0 %1100 }
 0x1a6   : > { %v1244_v38 = vpop.f32.mrb[0].mxu1 }
 0x1a7   : > { %v1245_v19 = vadd.f32 %v1244_v38, %v3492_v13  ;;  %v1246_v16 = vpop.f32.mrb[1].mxu1 }
 0x1a8   : > { %v1247_v26 = vadd.f32 %v1246_v16, %v3492_v13  ;;  %v1454_v16 = vrot.slane %v3675_v46, %v3044_v21 }
 0x1a9   : > { %v3495_v20 = vmax.f32 %v1245_v19, 0.0  ;;  %v1550_v19 = vrot.slane %v3677_v28, %v3039_v17 }
 0x1aa   : > { %v3526_v55 = vmax.f32 %v1247_v26, 0.0 }
 0x1ab   : > { %1419 = vrot.lane.b32.xlu0 %v3495_v20, %s2816_s29 }
 0x1c2   : > { %v1173_v3 = vpop.f32.mrb[0].mxu0 }
 0x1c3   : > { %v1174_v23 = vadd.f32 %v1173_v3, %v3492_v13  ;;  %v1175_v14 = vpop.f32.mrb[1].mxu0 }
 0x1c4   : > { %v1176_v29 = vadd.f32 %v1175_v14, %v3492_v13 }
 0x1c5   : > { %v3500_v61 = vmax.f32 %v1174_v23, 0.0 }
 0x1c6   : > { %v3520_v57 = vmax.f32 %v1176_v29, 0.0 }
 0x1c7   : > { %4230 = vst [vmem:[#allocation4_spill] sm:$0xff] %v3500_v61  ;;  %1507 = vrot.lane.b32.xlu0 %v3500_v61, %s2815_s28  ;;  %1415 = vrot.lane.b32.xlu1 %v3500_v61, %s2816_s29 }
 0x1c8   : > { %4231 = vst [vmem:[#allocation5_spill] sm:$0xff] %v3520_v57 }
 0x1cb   : > { %1511 = vrot.lane.b32.xlu0 %v3495_v20, %s2815_s28  ;;  %1803 = vrot.lane.b32.xlu1 %v3495_v20, %s2819_s8 }
 0x1cf   : > { %1599 = vrot.lane.b32.xlu0 %v3500_v61, %s2817_s30  ;;  %1891 = vrot.lane.b32.xlu1 %v3500_v61, %s2820_s9 }
 0x1d3   : > { %1603 = vrot.lane.b32.xlu0 %v3495_v20, %s2817_s30  ;;  %2075 = vrot.lane.b32.xlu1 %v3500_v61, %s2822_s11 }
 0x1d6   : > { %v1386_v25 = vpop.f32.mrb[2].mxu1 }
 0x1d7   : > { %v1388_v10 = vpop.f32.mrb[3].mxu1  ;;  %1691 = vrot.lane.b32.xlu0 %v3500_v61, %s2818_s7  ;;  %1417 = vrot.lane.b32.xlu1 %v3520_v57, %s2816_s29  ;;  %v1387_v47 = vadd.f32 %v1386_v25, %v3492_v13 }
 0x1d8   : > { %v1389_v5 = vadd.f32 %v1388_v10, %v3492_v13 }
 0x1d9   : > { %v3576_v50 = vmax.f32 %v1387_v47, 0.0 }
 0x1da   : > { %v3595_v52 = vmax.f32 %v1389_v5, 0.0 }
 0x1db   : > { %1695 = vrot.lane.b32.xlu0 %v3495_v20, %s2818_s7  ;;  %1421 = vrot.lane.b32.xlu1 %v3526_v55, %s2816_s29  ;;  %4233 = vst [vmem:[#allocation7_spill] sm:$0xff] %v3576_v50 }
 0x1dc   : > { %4234 = vst [vmem:[#allocation8_spill] sm:$0xff] %v3595_v52 }
 0x1df   : > { %1799 = vrot.lane.b32.xlu0 %v3500_v61, %s2819_s8  ;;  %1509 = vrot.lane.b32.xlu1 %v3520_v57, %s2815_s28 }
 0x1e2   : > { %v1315_v39 = vpop.f32.mrb[2].mxu0 }
 0x1e3   : > { %v1317_v49 = vpop.f32.mrb[3].mxu0  ;;  %1895 = vrot.lane.b32.xlu0 %v3495_v20, %s2820_s9  ;;  %1513 = vrot.lane.b32.xlu1 %v3526_v55, %s2815_s28  ;;  %v1316_v37 = vadd.f32 %v1315_v39, %v3492_v13 }
 0x1e4   : > { %v1318_v48 = vadd.f32 %v1317_v49, %v3492_v13 }
 0x1e5   : > { %v3561_v33 = vmax.f32 %v1316_v37, 0.0 }
 0x1e6   : > { %v3610_v1 = vmax.f32 %v1318_v48, 0.0 }
 0x1e7   : > { %1987 = vrot.lane.b32.xlu0 %v3495_v20, %s2821_s10  ;;  %1601 = vrot.lane.b32.xlu1 %v3520_v57, %s2817_s30  ;;  %4232 = vst [vmem:[#allocation6_spill] sm:$0xff] %v3561_v33 }
 0x1e8   : > { %4235 = vst [vmem:[#allocation9_spill] sm:$0xff] %v3610_v1 }
 0x1eb   : > { %1983 = vrot.lane.b32.xlu0 %v3500_v61, %s2821_s10  ;;  %1605 = vrot.lane.b32.xlu1 %v3526_v55, %s2817_s30 }
 0x1ef   : > { %2079 = vrot.lane.b32.xlu0 %v3495_v20, %s2822_s11  ;;  %1693 = vrot.lane.b32.xlu1 %v3520_v57, %s2818_s7 }
 0x1f3   : > { %1801 = vrot.lane.b32.xlu0 %v3520_v57, %s2819_s8  ;;  %1697 = vrot.lane.b32.xlu1 %v3526_v55, %s2818_s7 }
 0x1f7   : > { %1805 = vrot.lane.b32.xlu0 %v3526_v55, %s2819_s8  ;;  %1893 = vrot.lane.b32.xlu1 %v3520_v57, %s2820_s9 }
 0x1fb   : > { %1899 = vrot.lane.b32.xlu0 %v3561_v33, %s2820_s9  ;;  %1897 = vrot.lane.b32.xlu1 %v3526_v55, %s2820_s9 }
 0x1ff   : > { %1991 = vrot.lane.b32.xlu0 %v3561_v33, %s2821_s10  ;;  %1985 = vrot.lane.b32.xlu1 %v3520_v57, %s2821_s10 }
 0x203   : > { %1515 = vrot.lane.b32.xlu0 %v3561_v33, %s2815_s28  ;;  %1989 = vrot.lane.b32.xlu1 %v3526_v55, %s2821_s10 }
 0x207   : > { %1519 = vrot.lane.b32.xlu0 %v3576_v50, %s2815_s28  ;;  %2077 = vrot.lane.b32.xlu1 %v3520_v57, %s2822_s11 }
 0x20b   : > { %2083 = vrot.lane.b32.xlu0 %v3561_v33, %s2822_s11  ;;  %2081 = vrot.lane.b32.xlu1 %v3526_v55, %s2822_s11 }
 0x20f   : > { %1607 = vrot.lane.b32.xlu0 %v3561_v33, %s2817_s30  ;;  %1807 = vrot.lane.b32.xlu1 %v3561_v33, %s2819_s8 }
 0x213   : > { %1611 = vrot.lane.b32.xlu0 %v3576_v50, %s2817_s30  ;;  %1423 = vrot.lane.b32.xlu1 %v3561_v33, %s2816_s29 }
 0x217   : > { %1429 = vrot.lane.b32.xlu0 %v3595_v52, %s2816_s29  ;;  %1427 = vrot.lane.b32.xlu1 %v3576_v50, %s2816_s29 }
 0x21b   : > { %1613 = vrot.lane.b32.xlu0 %v3595_v52, %s2817_s30  ;;  %1699 = vrot.lane.b32.xlu1 %v3561_v33, %s2818_s7 }
 0x21d   : > { %v1420_v22 = vpop.permute.xlu0 %1419 }
 0x21f   : > { %1903 = vrot.lane.b32.xlu0 %v3576_v50, %s2820_s9  ;;  %1703 = vrot.lane.b32.xlu1 %v3576_v50, %s2818_s7 }
 0x223   : > { %1425 = vrot.lane.b32.xlu0 %v3610_v1, %s2816_s29  ;;  %1521 = vrot.lane.b32.xlu1 %v3595_v52, %s2815_s28 }
 0x227   : > { %1701 = vrot.lane.b32.xlu0 %v3610_v1, %s2818_s7  ;;  %1705 = vrot.lane.b32.xlu1 %v3595_v52, %s2818_s7 }
 0x22b   : > { %1809 = vrot.lane.b32.xlu0 %v3610_v1, %s2819_s8  ;;  %1811 = vrot.lane.b32.xlu1 %v3576_v50, %s2819_s8 }
 0x22f   : > { %1813 = vrot.lane.b32.xlu0 %v3595_v52, %s2819_s8  ;;  %1995 = vrot.lane.b32.xlu1 %v3576_v50, %s2821_s10 }
 0x233   : > { %1993 = vrot.lane.b32.xlu0 %v3610_v1, %s2821_s10  ;;  %1517 = vrot.lane.b32.xlu1 %v3610_v1, %s2815_s28 }
 0x237   : > { %1997 = vrot.lane.b32.xlu0 %v3595_v52, %s2821_s10  ;;  %1609 = vrot.lane.b32.xlu1 %v3610_v1, %s2817_s30 }
 0x239   : > { %v3636_v58 = vpop.permute.xlu0 %1507  ;;  %v3638_v54 = vpop.permute.xlu1 %1415 }
 0x23b   : > { %2087 = vrot.lane.b32.xlu0 %v3576_v50, %s2822_s11  ;;  %1901 = vrot.lane.b32.xlu1 %v3610_v1, %s2820_s9 }
 0x23d   : > { %v1512_v27 = vpop.permute.xlu0 %1511  ;;  %v3647_v0 = vpop.permute.xlu1 %1803 }
 0x23f   : > { %2235 = vperm.xlu0 %2806, %v2232_v11   ;;  %1905 = vrot.lane.b32.xlu1 %v3595_v52, %s2820_s9  ;;  %v2644_v11 = vld [vmem:[%s4206_s1 + $0x3] ss:$8 sm:$0xf] }
 0x241   : > { %v3651_v35 = vpop.permute.xlu0 %1599  ;;  %v3653_v44 = vpop.permute.xlu1 %1891 }
 0x242   : > { %4236 = vst [vmem:[#allocation10_spill] sm:$0xff] %v3653_v44 }
 0x243   : > { %2085 = vrot.lane.b32.xlu1 %v3610_v1, %s2822_s11 }
 0x245   : > { %v1604_v43 = vpop.permute.xlu0 %1603  ;;  %v3657_v41 = vpop.permute.xlu1 %2075 }
 0x246   : > { %4237 = vst [vmem:[#allocation11_spill] sm:$0xff] %v3657_v41 }
 0x247   : > { %2089 = vrot.lane.b32.xlu1 %v3595_v52, %s2822_s11  ;;  %v2653_v52 = vld [vmem:[%s4206_s1 + $0x40] ss:$8 sm:$0xf0] }
 0x249   : > { %v3673_v60 = vpop.permute.xlu0 %1691  ;;  %v1418_v62 = vpop.permute.xlu1 %1417 }
 0x24a   : > { %v1437_v12 = vsel %vm281_vm1, %v3638_v54, %v1418_v62  ;;  %v1436_v23 = vsel %vm281_vm1, %v1418_v62, %v1420_v22  ;;  %v3735_v62 = vor.u32 %v2645_v4, %v2644_v11 }
 0x24b   : > { %v1484_v32 = vmul.f32 %v1450_v31, %v1437_v12  ;;  %v1485_v37 = vmul.f32 %v1454_v16, %v1436_v23 }
 0x24d   : > { %v1696_v18 = vpop.permute.xlu0 %1695  ;;  %v3679_v9 = vpop.permute.xlu1 %1421 }
 0x24e   : > { %v1435_v3 = vsel %vm281_vm1, %v1420_v22, %v3679_v9 }
 0x24f   : > { %v1486_v39 = vmul.f32 %v1458_v51, %v1435_v3 }
 0x251   : > { %v3688_v63 = vpop.permute.xlu0 %1799  ;;  %v1510_v53 = vpop.permute.xlu1 %1509 }
 0x252   : > { %v1529_v45 = vsel %vm374_vm0, %v3636_v58, %v1510_v53  ;;  %v1528_v13 = vsel %vm374_vm0, %v1510_v53, %v1512_v27  ;;  %v1730_v53 = vrot.slane %v3735_v62, %v3044_v21 }
 0x253   : > { %v1576_v38 = vmul.f32 %v1542_v30, %v1529_v45  ;;  %v1577_v25 = vmul.f32 %v1546_v24, %v1528_v13  ;;  %v1734_v45 = vrot.slane %v3735_v62, %v3039_v17 }
 0x255   : > { %v3708_v14 = vpop.permute.xlu0 %1895  ;;  %v3710_v29 = vpop.permute.xlu1 %1513  ;;  %v2724_v26 = vpack.c.bf16 %v1576_v38, %v1484_v32  ;;  %v2742_v22 = vpack.c.bf16 %v1577_v25, %v1485_v37 }
 0x256   : > { %v1527_v10 = vsel %vm374_vm0, %v1512_v27, %v3710_v29  ;;  %v2642_v27 = vld [vmem:[%s4206_s1 + $0x2] ss:$8 sm:$0xf] }
 0x257   : > { %v1578_v49 = vmul.f32 %v1550_v19, %v1527_v10  ;;  %2725 = vmatprep.subr.bf16.mxu0 %v2724_v26  ;;  %v3737_v31 = vor.u32 %v2643_v7, %v2642_v27  ;;  %v2646_v7 = vld [vmem:[%s4206_s1 + $0x5] ss:$8 sm:$0xf] }
 0x259   : > { %v3715_v47 = vpop.permute.xlu0 %1987  ;;  %v3717_v5 = vpop.permute.xlu1 %1601  ;;  %v2740_v48 = vpack.c.bf16 %v1578_v49, %v1486_v39  ;;  %v1642_v51 = vrot.slane %v3737_v31, %v3039_v17  ;;  %v1638_v32 = vrot.slane %v3737_v31, %v3044_v21 }
 0x25a   : > { %v1620_v38 = vsel %vm468_vm2, %v3717_v5, %v1604_v43 }
 0x25b   : > { %2741 = vmatprep.subr.bf16.mxu1 %v2740_v48  ;;  %v1669_v10 = vmul.f32 %v1638_v32, %v1620_v38  ;;  %v2651_v32 = vld [vmem:[%s4206_s1 + $0x7] ss:$8 sm:$0xf0]  ;;  %v2648_v38 = vld [vmem:[%s4206_s1 + $0x6] ss:$8 sm:$0xf] }
 0x25c   : > { %2743 = vmatpush1.bf16.msra.mxu1 %v2742_v22 }
 0x25d   : > { %v3731_v59 = vpop.permute.xlu0 %1983  ;;  %v3733_v6 = vpop.permute.xlu1 %1605 }
 0x25e   : > { %v1619_v13 = vsel %vm468_vm2, %v1604_v43, %v3733_v6 }
 0x25f   : > { %v1670_v26 = vmul.f32 %v1642_v51, %v1619_v13 }
 0x261   : > { %v3739_v30 = vpop.permute.xlu0 %2079  ;;  %v3741_v12 = vpop.permute.xlu1 %1693 }
 0x262   : > { %v1712_v24 = vsel %vm562_vm3, %v3741_v12, %v1696_v18 }
 0x263   : > { %v1761_v3 = vmul.f32 %v1730_v53, %v1712_v24  ;;  %v2647_v53 = vld [vmem:[%s4206_s1 + $0x5] ss:$8 sm:$0xf0] }
 0x264   : > { %v3793_v13 = vor.u32 %v2647_v53, %v2646_v7 }
 0x265   : > { %v3760_v19 = vpop.permute.xlu0 %1801  ;;  %v3762_v16 = vpop.permute.xlu1 %1697  ;;  %v2746_v48 = vpack.c.bf16 %v1761_v3, %v1669_v10  ;;  %v2649_v3 = vld [vmem:[%s4206_s1 + $0x6] ss:$8 sm:$0xf0] }
 0x266   : > { %v1711_v23 = vsel %vm562_vm3, %v1696_v18, %v3762_v16  ;;  %v1838_v10 = vrot.slane %v3793_v13, %v3044_v21  ;;  %v1842_v53 = vrot.slane %v3793_v13, %v3039_v17 }
 0x267   : > { %v1762_v25 = vmul.f32 %v1734_v45, %v1711_v23  ;;  %v2650_v45 = vld [vmem:[%s4206_s1 + $0x7] ss:$8 sm:$0xf] }
 0x268   : > { %v3801_v23 = vor.u32 %v2651_v32, %v2650_v45 }
 0x269   : > { %v1806_v39 = vpop.permute.xlu0 %1805  ;;  %v3767_v49 = vpop.permute.xlu1 %1893  ;;  %v2744_v37 = vpack.c.bf16 %v1762_v25, %v1670_v26 }
 0x26a   : > { %v2026_v7 = vrot.slane %v3801_v23, %v3039_v17  ;;  %v2022_v50 = vrot.slane %v3801_v23, %v3044_v21 }
 0x26b   : > { %2745 = vmatprep.subr.bf16.mxu1 %v2744_v37  ;;  %v1819_v37 = vsel %vm672_vm4, %v3647_v0, %v1806_v39 }
 0x26c   : > { %2747 = vmatpush1.bf16.msra.mxu1 %v2746_v48  ;;  %v3810_v48 = vor.u32 %v2649_v3, %v2648_v38  ;;  %v1869_v3 = vmul.f32 %v1838_v10, %v1819_v37 }
 0x26d   : > { %v3769_v43 = vpop.permute.xlu0 %1899  ;;  %v1898_v22 = vpop.permute.xlu1 %1897 }
 0x26e   : > { %4238 = vst [vmem:[#allocation12_spill] sm:$0xff] %v3769_v43  ;;  %v1934_v32 = vrot.slane %v3810_v48, %v3039_v17  ;;  %v1910_v1 = vsel %vm766_vm5, %v1898_v22, %v3769_v43  ;;  %v1930_v61 = vrot.slane %v3810_v48, %v3044_v21 }
 0x271   : > { %v3771_v11 = vpop.permute.xlu0 %1991  ;;  %v3773_v4 = vpop.permute.xlu1 %1985 }
 0x272   : > { %4239 = vst [vmem:[#allocation13_spill] sm:$0xff] %v3771_v11 }
 0x275   : > { %v3775_v27 = vpop.permute.xlu0 %1515  ;;  %v1990_v18 = vpop.permute.xlu1 %1989 }
 0x276   : > { %4240 = vst [vmem:[#allocation14_spill] sm:$0xff] %v3775_v27  ;;  %v2002_v45 = vsel %vm860_vm6, %v1990_v18, %v3771_v11  ;;  %v2652_v11 = vld [vmem:[%s4206_s1 + $0x40] ss:$8 sm:$0xf]  ;;  %v2003_v10 = vsel %vm860_vm6, %v3715_v47, %v1990_v18  ;;  %v1526_v44 = vsel %vm374_vm0, %v3710_v29, %v3775_v27 }
 0x277   : > { %v2054_v37 = vmul.f32 %v2026_v7, %v2002_v45  ;;  %v3855_v57 = vor.u32 %v2653_v52, %v2652_v11  ;;  %v2053_v45 = vmul.f32 %v2022_v50, %v2003_v10  ;;  %v3867_v27 = vmul.f32 %v1554_v8, %v1526_v44  ;;  %v3904_v10 = vld [vmem:[%s4209_s4] sm:$0xff] }
 0x279   : > { %v3783_v51 = vpop.permute.xlu0 %1519  ;;  %v3785_v24 = vpop.permute.xlu1 %2077  ;;  %v2118_v52 = vrot.slane %v3855_v57, %v3039_v17  ;;  %v2114_v17 = vrot.slane %v3855_v57, %v3044_v21 }
 0x27a   : > { %4241 = vst [vmem:[#allocation15_spill] sm:$0xff] %v3785_v24  ;;  %v1462_v24 = vrot.slane %v3675_v46, %v3356_v40 }
 0x27d   : > { %v3803_v26 = vpop.permute.xlu0 %2083  ;;  %v2082_v25 = vpop.permute.xlu1 %2081 }
 0x27e   : > { %4242 = vst [vmem:[#allocation16_spill] sm:$0xff] %v3803_v26 }
 0x281   : > { %v3823_v33 = vpop.permute.xlu0 %1607  ;;  %v3825_v38 = vpop.permute.xlu1 %1807 }
 0x282   : > { %4243 = vst [vmem:[#allocation17_spill] sm:$0xff] %v3825_v38  ;;  %v1818_v41 = vsel %vm672_vm4, %v1806_v39, %v3825_v38  ;;  %v1911_v39 = vsel %vm766_vm5, %v3708_v14, %v1898_v22  ;;  %v1962_v38 = vmul.f32 %v1934_v32, %v1910_v1  ;;  %v1618_v32 = vsel %vm468_vm2, %v3733_v6, %v3823_v33 }
 0x283   : > { %v1870_v43 = vmul.f32 %v1842_v53, %v1818_v41  ;;  %v2750_v53 = vpack.c.bf16 %v1869_v3, %v3495_v20  ;;  %v1961_v11 = vmul.f32 %v1930_v61, %v1911_v39  ;;  %v2094_v20 = vsel %vm954_vm7, %v2082_v25, %v3803_v26 }
 0x284   : > { %v2752_v22 = vpack.c.bf16 %v2054_v37, %v1962_v38  ;;  %v2095_v61 = vsel %vm954_vm7, %v3739_v30, %v2082_v25 }
 0x285   : > { %v3857_v18 = vpop.permute.xlu0 %1611  ;;  %v3859_v41 = vpop.permute.xlu1 %1423  ;;  %v2748_v7 = vpack.c.bf16 %v1870_v43, %v3526_v55  ;;  %v2754_v44 = vpack.c.bf16 %v2053_v45, %v1961_v11  ;;  %v1646_v43 = vrot.slane %v3737_v31, %v3356_v40  ;;  %v2145_v3 = vmul.f32 %v2114_v17, %v2095_v61 }
 0x286   : > { %v1434_v29 = vsel %vm281_vm1, %v3679_v9, %v3859_v41  ;;  %v2146_v9 = vmul.f32 %v2118_v52, %v2094_v20  ;;  %v1446_v45 = vrot.slane %v3675_v46, %v3148_v34  ;;  %v1713_v52 = vsel %vm562_vm3, %v3673_v60, %v3741_v12 }
 0x287   : > { %v3871_v1 = vmul.f32 %v1462_v24, %v1434_v29  ;;  %2749 = vmatprep.subr.bf16.mxu1 %v2748_v7  ;;  %v1738_v24 = vrot.slane %v3735_v62, %v3356_v40  ;;  %v3906_v37 = vmul.f32 %v1646_v43, %v1618_v32  ;;  %v4246_v29 = vmov 0.0  }
 0x288   : > { %2751 = vmatpush1.bf16.msra.mxu1 %v2750_v53  ;;  %v1538_v11 = vrot.slane %v3677_v28, %v3148_v34  ;;  %v1566_v20 = vrot.slane %v3677_v28, %v3262_v36  ;;  %v1621_v61 = vsel %vm468_vm2, %v3651_v35, %v3717_v5  ;;  %v1630_v43 = vrot.slane %v3737_v31, %v3148_v34 }
 0x289   : > { %v1430_v50 = vpop.permute.xlu0 %1429  ;;  %2753 = vmatprep.subr.bf16.mxu1 %v2752_v22  ;;  %v3878_v8 = vpop.permute.xlu1 %1427  ;;  %4244 = vst [vmem:[#allocation18_spill] sm:$0xff] %v3906_v37  ;;  %v1474_v22 = vrot.slane %v3675_v46, %v3262_v36 }
 0x28a   : > { %v1438_v17 = vsel %vm281_vm1, %v1430_v50, %v3638_v54  ;;  %v1431_v12 = vsel %vm281_vm1, %v3878_v8, %v1430_v50  ;;  %v1722_v54 = vrot.slane %v3735_v62, %v3148_v34  ;;  %v1820_v50 = vsel %vm672_vm4, %v3760_v19, %v3647_v0 }
 0x28b   : > { %v1483_v39 = vmul.f32 %v1446_v45, %v1438_v17  ;;  %v1490_v55 = vmul.f32 %v1474_v22, %v1431_v12 }
 0x28c   : > { %2755 = vmatpush1.bf16.msra.mxu1 %v2754_v44  ;;  %v1634_v44 = vrot.slane %v3737_v31, %v3118_v56 }
 0x28d   : > { %v3893_v38 = vpop.permute.xlu0 %1613  ;;  %2328 = vmatprep.subr.mxu1 %v2146_v9  ;;  %v3895_v21 = vpop.permute.xlu1 %1699  ;;  %v1834_v9 = vrot.slane %v3793_v13, %v3118_v56 }
 0x28e   : > { %v1710_v25 = vsel %vm562_vm3, %v3762_v16, %v3895_v21  ;;  %v1726_v16 = vrot.slane %v3735_v62, %v3118_v56  ;;  %v1622_v0 = vsel %vm468_vm2, %v3893_v38, %v3651_v35 }
 0x28f   : > { %v3908_v6 = vmul.f32 %v1738_v24, %v1710_v25  ;;  %v1868_v17 = vmul.f32 %v1834_v9, %v1820_v50  ;;  %v2005_v9 = vsel %vm860_vm6, %v3731_v59, %v3773_v4  ;;  %v4247_v50 = vld [vmem:[#allocation5_spill] sm:$0xff] }
 0x290   : > { %2329 = vmatpush1.msra.mxu1 %v2145_v3  ;;  %v1760_v3 = vmul.f32 %v1726_v16, %v1713_v52  ;;  %v1830_v16 = vrot.slane %v3793_v13, %v3148_v34  ;;  %v1922_v52 = vrot.slane %v3810_v48, %v3148_v34 }
 0x291   : > { %4245 = vst [vmem:[#allocation19_spill] sm:$0xff] %v3908_v6  ;;  %v3912_v7 = vpop.permute.xlu0 %1903  ;;  %2655 = vmatmul.mubr.msk.f32.vlgmr.msra.gmra.mrb[4].mxu1 %vm1103_vm8, %v3904_v10  ;;  %v3916_v53 = vpop.permute.xlu1 %1703  ;;  %v1668_v6 = vmul.f32 %v1634_v44, %v1621_v61  ;;  %v1821_v44 = vsel %vm672_vm4, %v3688_v63, %v3760_v19  ;;  %v2014_v61 = vrot.slane %v3801_v23, %v3148_v34 }
 0x292   : > { %2518 = vmatprep.mubr.f32.mxu1 %v4246_v29  ;;  %v1926_v29 = vrot.slane %v3810_v48, %v3118_v56  ;;  %v2106_v19 = vrot.slane %v3855_v57, %v3148_v34 }
 0x293   : > { %v2728_v12 = vpack.c.bf16 %v1760_v3, %v1668_v6  ;;  %v1867_v6 = vmul.f32 %v1830_v16, %v1821_v44  ;;  %v1470_v3 = vrot.slane %v3675_v46, %v3265_v42  ;;  %v1746_v16 = vrot.slane %v3735_v62, %v3265_v42 }
 0x295   : > { %v3949_v24 = vpop.permute.xlu0 %1425  ;;  %v1522_v32 = vpop.permute.xlu1 %1521 }
 0x296   : > { %v1523_v5 = vsel %vm374_vm0, %v3783_v51, %v1522_v32  ;;  %v1530_v25 = vsel %vm374_vm0, %v1522_v32, %v3636_v58  ;;  %v2018_v58 = vrot.slane %v3801_v23, %v3118_v56 }
 0x297   : > { %v1575_v26 = vmul.f32 %v1538_v11, %v1530_v25  ;;  %v1582_v37 = vmul.f32 %v1566_v20, %v1523_v5  ;;  %v2732_v5 = vpack.c.bf16 %v1868_v17, %v4247_v50  ;;  %v1854_v17 = vrot.slane %v3793_v13, %v3265_v42 }
 0x299   : > { %v2726_v45 = vpack.c.bf16 %v1575_v26, %v1483_v39  ;;  %v3975_v22 = vpop.permute.xlu0 %1701  ;;  %v1706_v11 = vpop.permute.xlu1 %1705  ;;  %v2772_v20 = vpack.c.bf16 %v1582_v37, %v1490_v55  ;;  %v2004_v26 = vsel %vm860_vm6, %v3773_v4, %v3715_v47  ;;  %v1667_v55 = vmul.f32 %v1630_v43, %v1622_v0 }
 0x29a   : > { %v1714_v35 = vsel %vm562_vm3, %v1706_v11, %v3673_v60  ;;  %v2110_v39 = vrot.slane %v3855_v57, %v3118_v56  ;;  %v1658_v60 = vrot.slane %v3737_v31, %v3262_v36  ;;  %v1912_v47 = vsel %vm766_vm5, %v3767_v49, %v3708_v14  ;;  %v4248_v14 = vld [vmem:[#allocation10_spill] sm:$0xff] }
 0x29b   : > { %v1759_v37 = vmul.f32 %v1722_v54, %v1714_v35  ;;  %2727 = vmatpush1.bf16.msra.mxu0 %v2726_v45  ;;  %2773 = vmatprep.subr.bf16.mxu1 %v2772_v20  ;;  %v2052_v32 = vmul.f32 %v2018_v58, %v2004_v26  ;;  %v1466_v54 = vrot.slane %v3675_v46, %v3359_v2  ;;  %v4250_v26 = vld [vmem:[#allocation15_spill] sm:$0xff] }
 0x29c   : > { %2729 = vmatprep.subr.bf16.mxu0 %v2728_v12  ;;  %v1913_v25 = vsel %vm766_vm5, %v4248_v14, %v3767_v49  ;;  %v1742_v4 = vrot.slane %v3735_v62, %v3359_v2  ;;  %v1750_v0 = vrot.slane %v3735_v62, %v3262_v36  ;;  %v1960_v58 = vmul.f32 %v1926_v29, %v1912_v47  ;;  %v4249_v49 = vld [vmem:[#allocation4_spill] sm:$0xff] }
 0x29d   : > { %v2730_v34 = vpack.c.bf16 %v1759_v37, %v1667_v55  ;;  %v4004_v43 = vpop.permute.xlu0 %1809  ;;  %v1812_v56 = vpop.permute.xlu1 %1811  ;;  %v2051_v45 = vmul.f32 %v2014_v61, %v2005_v9  ;;  %v1846_v46 = vrot.slane %v3793_v13, %v3356_v40  ;;  %v1850_v20 = vrot.slane %v3793_v13, %v3359_v2 }
 0x29e   : > { %v2734_v44 = vpack.c.bf16 %v1867_v6, %v4249_v49  ;;  %v1858_v35 = vrot.slane %v3793_v13, %v3262_v36  ;;  %v2030_v29 = vrot.slane %v3801_v23, %v3356_v40  ;;  %v1959_v61 = vmul.f32 %v1922_v52, %v1913_v25  ;;  %v4252_v49 = vld [vmem:[#allocation14_spill] sm:$0xff] }
 0x29f   : > { %2731 = vmatpush1.bf16.msra.mxu0 %v2730_v34  ;;  %v2096_v55 = vsel %vm954_vm7, %v4250_v26, %v3739_v30  ;;  %v1433_v37 = vsel %vm281_vm1, %v3859_v41, %v3949_v24  ;;  %v2736_v6 = vpack.c.bf16 %v2052_v32, %v1960_v58  ;;  %v1432_v47 = vsel %vm281_vm1, %v3949_v24, %v3878_v8  ;;  %v4251_v24 = vld [vmem:[#allocation11_spill] sm:$0xff] }
 0x2a0   : > { %2733 = vmatprep.subr.bf16.mxu0 %v2732_v5  ;;  %v2034_v52 = vrot.slane %v3801_v23, %v3359_v2  ;;  %v1558_v9 = vrot.slane %v3677_v28, %v3359_v2  ;;  %v1562_v30 = vrot.slane %v3677_v28, %v3265_v42  ;;  %v2738_v34 = vpack.c.bf16 %v2051_v45, %v1959_v61 }
 0x2a1   : > { %v1814_v12 = vpop.permute.xlu0 %1813  ;;  %v4030_v62 = vpop.permute.xlu1 %1995  ;;  %v1707_v41 = vsel %vm562_vm3, %v3916_v53, %v1706_v11  ;;  %v1650_v32 = vrot.slane %v3737_v31, %v3359_v2  ;;  %v1654_v8 = vrot.slane %v3737_v31, %v3265_v42  ;;  %v2097_v50 = vsel %vm954_vm7, %v4251_v24, %v4250_v26 }
 0x2a2   : > { %v2144_v5 = vmul.f32 %v2110_v39, %v2096_v55  ;;  %v1615_v28 = vsel %vm468_vm2, %v3857_v18, %v3893_v38  ;;  %v1488_v25 = vmul.f32 %v1466_v54, %v1433_v37  ;;  %v1489_v58 = vmul.f32 %v1470_v3, %v1432_v47 }
 0x2a3   : > { %2735 = vmatpush1.bf16.msra.mxu0 %v2734_v44  ;;  %v1709_v45 = vsel %vm562_vm3, %v3895_v21, %v3975_v22  ;;  %v1708_v38 = vsel %vm562_vm3, %v3975_v22, %v3916_v53  ;;  %v1766_v54 = vmul.f32 %v1750_v0, %v1707_v41  ;;  %v2143_v26 = vmul.f32 %v2106_v19, %v2097_v50  ;;  %v4253_v41 = vld [vmem:[#allocation17_spill] sm:$0xff] }
 0x2a4   : > { %2737 = vmatprep.subr.bf16.mxu0 %v2736_v6  ;;  %v1674_v21 = vmul.f32 %v1658_v60, %v1615_v28  ;;  %v2038_v55 = vrot.slane %v3801_v23, %v3265_v42  ;;  %v1764_v37 = vmul.f32 %v1742_v4, %v1709_v45  ;;  %v1816_v53 = vsel %vm672_vm4, %v4004_v43, %v1812_v56 }
 0x2a5   : > { %v1518_v11 = vpop.permute.xlu1 %1517  ;;  %v1994_v3 = vpop.permute.xlu0 %1993  ;;  %v1765_v47 = vmul.f32 %v1746_v16, %v1708_v38  ;;  %v1815_v19 = vsel %vm672_vm4, %v1812_v56, %v1814_v12  ;;  %v1817_v16 = vsel %vm672_vm4, %v4253_v41, %v4004_v43  ;;  %v1872_v50 = vmul.f32 %v1850_v20, %v1816_v53 }
 0x2a6   : > { %v1524_v31 = vsel %vm374_vm0, %v1518_v11, %v3783_v51  ;;  %v1525_v39 = vsel %vm374_vm0, %v4252_v49, %v1518_v11  ;;  %v1822_v51 = vsel %vm672_vm4, %v1814_v12, %v3688_v63  ;;  %v1873_v56 = vmul.f32 %v1854_v17, %v1815_v19  ;;  %v4264_v19 = vld [vmem:[#allocation6_spill] sm:$0xff] }
 0x2a7   : > { %v1580_v44 = vmul.f32 %v1558_v9, %v1525_v39  ;;  %v1581_v61 = vmul.f32 %v1562_v30, %v1524_v31  ;;  %2739 = vmatpush1.bf16.msra.mxu0 %v2738_v34  ;;  %v1874_v4 = vmul.f32 %v1858_v35, %v1822_v51  ;;  %v2776_v34 = vpack.c.bf16 %v1766_v54, %v1674_v21  ;;  %v4257_v39 = vld [vmem:[#allocation7_spill] sm:$0xff]  ;;  %v4258_v54 = vld [vmem:[#allocation12_spill] sm:$0xff]  ;;  %v4262_v51 = vld [vmem:[#allocation18_spill] sm:$0xff] }
 0x2a8   : > { %2257 = vmatprep.subr.mxu0 %v2144_v5  ;;  %v4254_v43 = vpack.c.bf16 %v3867_v27, %v3871_v1  ;;  %v1938_v20 = vrot.slane %v3810_v48, %v3356_v40  ;;  %v4255_v5 = vmov 0.0   ;;  %v2000_v28 = vsel %vm860_vm6, %v1994_v3, %v4030_v62  ;;  %v4261_v21 = vld [vmem:[#allocation19_spill] sm:$0xff] }
 0x2a9   : > { %v2774_v22 = vpack.c.bf16 %v1581_v61, %v1489_v58  ;;  %v1610_v0 = vpop.permute.xlu1 %1609  ;;  %v2756_v6 = vpack.c.bf16 %v1580_v44, %v1488_v25  ;;  %v4256_v25 = vld [vmem:[#allocation8_spill] sm:$0xff]  ;;  %v1946_v27 = vrot.slane %v3810_v48, %v3265_v42  ;;  %v1950_v1 = vrot.slane %v3810_v48, %v3262_v36  ;;  %v4259_v44 = vld [vmem:[#allocation9_spill] sm:$0xff] }
 0x2aa   : > { %v1616_v63 = vsel %vm468_vm2, %v1610_v0, %v3857_v18  ;;  %v1617_v60 = vsel %vm468_vm2, %v3823_v33, %v1610_v0  ;;  %v1942_v18 = vrot.slane %v3810_v48, %v3359_v2  ;;  %v1998_v33 = vpop.permute.xlu0 %1997  ;;  %v2780_v11 = vpack.c.bf16 %v1874_v4, %v4256_v25 }
 0x2ab   : > { %v1672_v9 = vmul.f32 %v1650_v32, %v1617_v60  ;;  %v1673_v30 = vmul.f32 %v1654_v8, %v1616_v63  ;;  %2258 = vmatpush1.msra.mxu0 %v2143_v26  ;;  %2775 = vmatpush1.bf16.msra.mxu1 %v2774_v22  ;;  %v2042_v8 = vrot.slane %v3801_v23, %v3262_v36  ;;  %v4265_v23 = vld [vmem:[#allocation16_spill] sm:$0xff] }
 0x2ac   : > { %2654 = vmatmul.mubr.msk.f32.vlgmr.msra.gmra.mrb[4].mxu0 %vm1103_vm8, %v3904_v10  ;;  %2757 = vmatprep.subr.bf16.mxu0 %v2756_v6  ;;  %v1871_v58 = vmul.f32 %v1846_v46, %v1817_v16  ;;  %v1999_v45 = vsel %vm860_vm6, %v4030_v62, %v1998_v33  ;;  %v2006_v31 = vsel %vm860_vm6, %v1998_v33, %v3731_v59  ;;  %v4260_v62 = vld [vmem:[#allocation13_spill] sm:$0xff] }
 0x2ad   : > { %v2778_v35 = vpack.c.bf16 %v1765_v47, %v1673_v30  ;;  %2777 = vmatprep.subr.bf16.mxu1 %v2776_v34  ;;  %v1902_v12 = vpop.permute.xlu1 %1901  ;;  %v2760_v32 = vpack.c.bf16 %v1764_v37, %v1672_v9  ;;  %2759 = vmatpush1.bf16.msra.mxu0 %v4254_v43  ;;  %v2126_v49 = vrot.slane %v3855_v57, %v3359_v2 }
 0x2ae   : > { %v1908_v17 = vsel %vm766_vm5, %v1902_v12, %v3912_v7  ;;  %2447 = vmatprep.mubr.f32.mxu0 %v4255_v5  ;;  %v2782_v38 = vpack.c.bf16 %v1873_v56, %v4257_v39  ;;  %v1909_v48 = vsel %vm766_vm5, %v4258_v54, %v1902_v12  ;;  %v2764_v61 = vpack.c.bf16 %v1872_v50, %v4259_v44  ;;  %v2088_v63 = vpop.permute.xlu0 %2087  ;;  %v2530_v44 = vld [vmem:[%s2876_s27 + $0x28] sm:$0xff] }
 0x2af   : > { %2761 = vmatprep.subr.bf16.mxu0 %v2760_v32  ;;  %2779 = vmatpush1.bf16.msra.mxu1 %v2778_v35  ;;  %v1964_v13 = vmul.f32 %v1942_v18, %v1908_v17  ;;  %v2001_v26 = vsel %vm860_vm6, %v4260_v62, %v1994_v3  ;;  %v2056_v59 = vmul.f32 %v2034_v52, %v2000_v28  ;;  %v2528_v32 = vld [vmem:[%s2876_s27 + $0x18] sm:$0xff]  ;;  %v2525_v28 = vld [vmem:[%s2876_s27] sm:$0xff] }
 0x2b0   : > { %2781 = vmatprep.subr.bf16.mxu1 %v2780_v11  ;;  %v4263_v37 = vpack.c.bf16 %v4261_v21, %v4262_v51  ;;  %v2057_v0 = vmul.f32 %v2038_v55, %v1999_v45  ;;  %v2058_v6 = vmul.f32 %v2042_v8, %v2006_v31  ;;  %v2766_v2 = vpack.c.bf16 %v1871_v58, %v4264_v19 }
 0x2b1   : > { %v1906_v46 = vpop.permute.xlu1 %1905  ;;  %v1963_v52 = vmul.f32 %v1938_v20, %v1909_v48  ;;  %v2768_v9 = vpack.c.bf16 %v2056_v59, %v1964_v13  ;;  %v2130_v34 = vrot.slane %v3855_v57, %v3265_v42  ;;  %v2134_v41 = vrot.slane %v3855_v57, %v3262_v36  ;;  %v2531_v48 = vld [vmem:[%s2876_s27 + $0x30] sm:$0xff] }
 0x2b2   : > { %2763 = vmatpush1.bf16.msra.mxu0 %v4263_v37  ;;  %v1907_v53 = vsel %vm766_vm5, %v3912_v7, %v1906_v46  ;;  %v1914_v22 = vsel %vm766_vm5, %v1906_v46, %v4248_v14  ;;  %v2055_v7 = vmul.f32 %v2030_v29, %v2001_v26  ;;  %v2122_v50 = vrot.slane %v3855_v57, %v3356_v40  ;;  %v2532_v26 = vld [vmem:[%s2876_s27 + $0x38] sm:$0xff] }
 0x2b3   : > { %v1965_v47 = vmul.f32 %v1946_v27, %v1907_v53  ;;  %v1966_v3 = vmul.f32 %v1950_v1, %v1914_v22  ;;  %2765 = vmatprep.subr.bf16.mxu0 %v2764_v61  ;;  %2783 = vmatpush1.bf16.msra.mxu1 %v2782_v38  ;;  %v2526_v27 = vld [vmem:[%s2876_s27 + $0x8] sm:$0xff]  ;;  %v2529_v38 = vld [vmem:[%s2876_s27 + $0x20] sm:$0xff] }
 0x2b4   : > { %v2770_v16 = vpack.c.bf16 %v2055_v7, %v1963_v52 }
 0x2b5   : > { %v2786_v60 = vpack.c.bf16 %v2057_v0, %v1965_v47  ;;  %v2086_v4 = vpop.permute.xlu1 %2085  ;;  %v2784_v30 = vpack.c.bf16 %v2058_v6, %v1966_v3 }
 0x2b6   : > { %2767 = vmatpush1.bf16.msra.mxu0 %v2766_v2  ;;  %v2092_v14 = vsel %vm954_vm7, %v2086_v4, %v2088_v63  ;;  %v2093_v29 = vsel %vm954_vm7, %v4265_v23, %v2086_v4 }
 0x2b7   : > { %v2148_v55 = vmul.f32 %v2126_v49, %v2092_v14  ;;  %2769 = vmatprep.subr.bf16.mxu0 %v2768_v9  ;;  %2785 = vmatprep.subr.bf16.mxu1 %v2784_v30  ;;  %v2147_v40 = vmul.f32 %v2122_v50, %v2093_v29 }
 0x2b8   : > { %2787 = vmatpush1.bf16.msra.mxu1 %v2786_v60 }
 0x2b9   : > { %v2090_v18 = vpop.permute.xlu1 %2089 }
 0x2ba   : > { %2771 = vmatpush1.bf16.msra.mxu0 %v2770_v16  ;;  %v2091_v56 = vsel %vm954_vm7, %v2088_v63, %v2090_v18  ;;  %v2098_v36 = vsel %vm954_vm7, %v2090_v18, %v4251_v24 }
 0x2bb   : > { %v2149_v42 = vmul.f32 %v2130_v34, %v2091_v56  ;;  %v2150_v33 = vmul.f32 %v2134_v41, %v2098_v36  ;;  %2399 = vmatprep.subr.mxu0 %v2148_v55 }
 0x2bd   : > { %2470 = vmatprep.subr.mxu1 %v2150_v33 }
 0x2be   : > { %2400 = vmatpush1.msra.mxu0 %v2147_v40  ;;  %2471 = vmatpush1.msra.mxu1 %v2149_v42  ;;  %v2236_v57 = vpop.permute.xlu0 %2235 }
 0x2bf   : > { %2656 = vmatmul.mubr.msk.f32.vlgmr.msra.gmra.mrb[6].mxu0 %vm1103_vm8, %v3904_v10  ;;  %2657 = vmatmul.mubr.msk.f32.vlgmr.msra.gmra.mrb[6].mxu1 %vm1103_vm8, %v3904_v10 }
 0x364   : > { %v2378_v35 = vpop.f32.mrb[4].mxu1 }
 0x365   : > { %v2379_v24 = vadd.f32 %v2378_v35, %v2236_v57  ;;  %v2380_v12 = vpop.f32.mrb[5].mxu1 }
 0x366   : > { %v2381_v8 = vadd.f32 %v2380_v12, %v2236_v57 }
 0x367   : > { %v2535_v43 = vadd.f32 %v2527_v15, %v2379_v24 }
 0x368   : > { %v2536_v10 = vadd.f32 %v2528_v32, %v2381_v8 }
 0x369   : > { %v2543_v20 = vmax.f32 %v2535_v43, 0.0 }
 0x36a   : > { %v2544_v17 = vmax.f32 %v2536_v10, 0.0 }
 0x36b   : > { %2551 = vst [vmem:[%s4186_s25 + $0x10] sm:$0xff] %v2543_v20 }
 0x36c   : > { %2552 = vst [vmem:[%s4186_s25 + $0x18] sm:$0xff] %v2544_v17 }
 0x37f   : > { %v2307_v5 = vpop.f32.mrb[4].mxu0 }
 0x380   : > { %v2308_v25 = vadd.f32 %v2307_v5, %v2236_v57  ;;  %v2309_v11 = vpop.f32.mrb[5].mxu0 }
 0x381   : > { %v2310_v1 = vadd.f32 %v2309_v11, %v2236_v57 }
 0x382   : > { %v2533_v58 = vadd.f32 %v2525_v28, %v2308_v25 }
 0x383   : > { %v2534_v45 = vadd.f32 %v2526_v27, %v2310_v1 }
 0x384   : > { %v2541_v31 = vmax.f32 %v2533_v58, 0.0 }
 0x385   : > { %v2542_v49 = vmax.f32 %v2534_v45, 0.0 }
 0x386   : > { %2549 = vst [vmem:[%s4186_s25] sm:$0xff] %v2541_v31 }
 0x387   : > { %2550 = vst [vmem:[%s4186_s25 + $0x8] sm:$0xff] %v2542_v49 }
 0x392   : > { %v2449_v39 = vpop.f32.mrb[6].mxu0  ;;  %v2520_v54 = vpop.f32.mrb[6].mxu1 }
 0x393   : > { %v2450_v13 = vadd.f32 %v2449_v39, %v2236_v57  ;;  %v2451_v46 = vpop.f32.mrb[7].mxu0  ;;  %v2521_v61 = vadd.f32 %v2520_v54, %v2236_v57  ;;  %v2522_v62 = vpop.f32.mrb[7].mxu1 }
 0x394   : > { %v2452_v59 = vadd.f32 %v2451_v46, %v2236_v57  ;;  %v2523_v21 = vadd.f32 %v2522_v62, %v2236_v57 }
 0x395   : > { %v2537_v51 = vadd.f32 %v2529_v38, %v2450_v13  ;;  %v2539_v37 = vadd.f32 %v2531_v48, %v2521_v61 }
 0x396   : > { %v2538_v53 = vadd.f32 %v2530_v44, %v2452_v59  ;;  %v2540_v22 = vadd.f32 %v2532_v26, %v2523_v21 }
 0x397   : > { %v2545_v0 = vmax.f32 %v2537_v51, 0.0  ;;  %v2547_v6 = vmax.f32 %v2539_v37, 0.0 }
 0x398   : > { %v2546_v47 = vmax.f32 %v2538_v53, 0.0  ;;  %v2548_v3 = vmax.f32 %v2540_v22, 0.0 }
 0x399   : > { %2553 = vst [vmem:[%s4186_s25 + $0x20] sm:$0xff] %v2545_v0  ;;  %2555 = vst [vmem:[%s4186_s25 + $0x30] sm:$0xff] %v2547_v6 }
 0x39a   : > { %2554 = vst [vmem:[%s4186_s25 + $0x28] sm:$0xff] %v2546_v47  ;;  %2556 = vst [vmem:[%s4186_s25 + $0x38] sm:$0xff] %v2548_v3 }
 0x39b PF: > { %s16_s21 = sadd.s32 1, %s2813_s21  }
 0x39c   : > { %p13_p4 = scmp.ge.s32.totalorder %s16_s21, 4  }
 0x39e   :  { %15 = sbr.rel (!%p13_p4) target bundleno = 1 (0x1), region = 81 }

</bundles_post_ra>
